<compile_context>
chip_gen: v6e
topology: v6e:2x2x1
jax: 0.10.0
libtpu: 0.0.40
codegen_flags: <defaults>
</compile_context>

<pallas_src>
import jax
import jax.numpy as jnp
from jax.experimental import pallas as pl
from jax.experimental.pallas import tpu as pltpu


# ----------------------------- config ---------------------------------------
class Config:
    vocab_size = 50
    embedding_dim = 32
    rnn_hidden_size = 32
    rnn_num_layers = 1
    rnn_bidirectional = True
    num_classes = 4
    dropout_prob = 0.1
    use_glove = False
    freeze_embeddings = False


LANE = 128  # padded FC output width (lane-dense out_spec)


# ----------------------------- Pallas kernel --------------------------------
def lstm_fc_kernel(ids_ref,    # (B, T)    int32  SMEM
                   emb_ref,    # (V, E)    f32    VMEM  (row 0 == padding row, zero)
                   wih_ref,    # (2E, 8H)  bf16   gate-grouped; rows 0:E fwd, E:2E bwd
                   b_ref,      # (1, 8H)   f32    combined b_ih+b_hh, gate-grouped
                   whh_ref,    # (2H, 8H)  bf16   block-structured recurrent weights
                   wfc_ref,    # (2H, 128) bf16   FC weights, zero-padded to 128 lanes
                   bfc_ref,    # (1, 128)  f32    FC bias, zero-padded
                   out_ref,    # (B, 128)  f32
                   xpair_ref): # (T*B, 2E) f32    VMEM scratch
    B, T = ids_ref.shape
    E = emb_ref.shape[1]
    H2 = whh_ref.shape[0]        # 2H (fused fwd|bwd state width)
    H4 = 2 * H2                  # 4H

    # --- prologue 1: in-kernel embedding gather + time-reverse pairing ---
    # xpair row t*B+b = [emb[ids[b, t]] | emb[ids[b, T-1-t]]]
    # each embedding row is loaded once (dynamic row index from SMEM) and stored
    # into its forward slot (time t) and its backward slot (time T-1-t).
    for t in range(T):
        for b in range(B):
            row = emb_ref[pl.ds(ids_ref[b, t], 1), :]                     # (1, E)
            xpair_ref[pl.ds(t * B + b, 1), 0:E] = row                     # fwd slot
            xpair_ref[pl.ds((T - 1 - t) * B + b, 1), E:2 * E] = row       # bwd slot

    # --- prologue 2: hoisted input projection (one wide MXU matmul, bias folded) ---
    xproj = jnp.dot(xpair_ref[...].astype(jnp.bfloat16), wih_ref[...],
                    preferred_element_type=jnp.float32) + b_ref[...]      # (T*B, 8H)

    whh = whh_ref[...]                                                    # (2H, 8H) bf16

    # fused state: lanes [0:H] = forward, [H:2H] = backward
    h = jnp.zeros((B, H2), jnp.bfloat16)
    c = jnp.zeros((B, H2), jnp.float32)

    # --- fused fwd+bwd recurrence, statically unrolled ---
    for t in range(T):
        gates = xproj[t * B:(t + 1) * B, :] + jnp.dot(
            h, whh, preferred_element_type=jnp.float32)                   # (B, 8H)
        sif = jax.nn.sigmoid(gates[:, 0:H4])           # i|f blocks (both directions)
        g = jnp.tanh(gates[:, H4:H4 + H2])             # g block
        o = jax.nn.sigmoid(gates[:, H4 + H2:H4 + 2 * H2])                 # o block
        c = sif[:, H2:H4] * c + sif[:, 0:H2] * g
        h = (o * jnp.tanh(c)).astype(jnp.bfloat16)     # stays bf16 for the next dot

    # --- final FC; h already == concat(h_fwd_final, h_bwd_final) ---
    out_ref[...] = (jnp.dot(h, wfc_ref[...], preferred_element_type=jnp.float32)
                    + bfc_ref[...])


# ----------------------------- param packing ---------------------------------
def pack_params(params, cfg):
    """Repack PyTorch-layout LSTM params into the fused gate-grouped layout.

    8H columns = [i_f|i_b, f_f|f_b, g_f|g_b, o_f|o_b], each sub-block H wide.
    Note: params here use right-multiply layout (E,4H)/(H,4H)/(2H,C); loading a
    real PyTorch checkpoint requires transposing nn.LSTM/nn.Linear weights.
    """
    E, H, C = cfg.embedding_dim, cfg.rnn_hidden_size, cfg.num_classes
    wih_big = jnp.zeros((2 * E, 8 * H), jnp.float32)
    whh_big = jnp.zeros((2 * H, 8 * H), jnp.float32)
    b_big = jnp.zeros((1, 8 * H), jnp.float32)
    for k in range(4):                       # gates in PyTorch order i, f, g, o
        src = slice(k * H, (k + 1) * H)
        col_f = slice(2 * k * H, (2 * k + 1) * H)
        col_b = slice((2 * k + 1) * H, (2 * k + 2) * H)
        wih_big = wih_big.at[0:E, col_f].set(params["wih_f"][:, src])
        wih_big = wih_big.at[E:2 * E, col_b].set(params["wih_b"][:, src])
        whh_big = whh_big.at[0:H, col_f].set(params["whh_f"][:, src])
        whh_big = whh_big.at[H:2 * H, col_b].set(params["whh_b"][:, src])
        b_big = b_big.at[:, col_f].set(params["b_f"][:, src])
        b_big = b_big.at[:, col_b].set(params["b_b"][:, src])

    # FC padded to a full 128-lane output block (unmasked stores in-kernel).
    wfc_pad = jnp.zeros((2 * H, LANE), jnp.float32).at[:, :C].set(params["wfc"])
    bfc_pad = jnp.zeros((1, LANE), jnp.float32).at[:, :C].set(params["bfc"])

    return dict(
        embedding=params["embedding"].astype(jnp.float32),   # (V, E), row 0 zero
        wih_big=wih_big.astype(jnp.bfloat16),
        whh_big=whh_big.astype(jnp.bfloat16),
        b_big=b_big,
        wfc_pad=wfc_pad.astype(jnp.bfloat16),
        bfc_pad=bfc_pad,
    )


# ----------------------------- wrapper ---------------------------------------
def text_rnn_forward(x_ids, packed, cfg):
    B, T = x_ids.shape
    C = cfg.num_classes
    E = cfg.embedding_dim

    smem = pl.BlockSpec(memory_space=pltpu.MemorySpace.SMEM)
    vmem = pl.BlockSpec(memory_space=pltpu.MemorySpace.VMEM)

    out_pad = pl.pallas_call(
        lstm_fc_kernel,
        out_shape=jax.ShapeDtypeStruct((B, LANE), jnp.float32),
        in_specs=[smem, vmem, vmem, vmem, vmem, vmem, vmem],
        out_specs=vmem,
        scratch_shapes=[pltpu.VMEM((T * B, 2 * E), jnp.float32)],
    )(x_ids.astype(jnp.int32), packed["embedding"], packed["wih_big"],
      packed["b_big"], packed["whh_big"], packed["wfc_pad"], packed["bfc_pad"])
    return out_pad[:, :C]


# ----------------------------- pure-JAX reference ----------------------------
def text_rnn_reference(x_ids, params, cfg):
    """f32 reference matching nn.Embedding(padding_idx=0) + nn.LSTM(bi) + fc."""
    B, T = x_ids.shape
    H = cfg.rnn_hidden_size
    emb = jnp.take(params["embedding"], x_ids, axis=0)   # (B, T, E)

    def step(h, c, x_t, wih, whh, b):
        gates = x_t @ wih + h @ whh + b                  # (B, 4H) gate order i,f,g,o
        i = jax.nn.sigmoid(gates[:, 0:H])
        f = jax.nn.sigmoid(gates[:, H:2 * H])
        g = jnp.tanh(gates[:, 2 * H:3 * H])
        o = jax.nn.sigmoid(gates[:, 3 * H:4 * H])
        c = f * c + i * g
        return o * jnp.tanh(c), c

    hf = jnp.zeros((B, H)); cf = jnp.zeros((B, H))
    hb = jnp.zeros((B, H)); cb = jnp.zeros((B, H))
    for t in range(T):
        hf, cf = step(hf, cf, emb[:, t, :], params["wih_f"], params["whh_f"], params["b_f"])
        hb, cb = step(hb, cb, emb[:, T - 1 - t, :], params["wih_b"], params["whh_b"], params["b_b"])
    hidden = jnp.concatenate([hf, hb], axis=1)           # == cat(h_n[-2], h_n[-1])
    return hidden @ params["wfc"] + params["bfc"]


# ----------------------------- param init ------------------------------------
def init_params(cfg, key):
    E, H, C = cfg.embedding_dim, cfg.rnn_hidden_size, cfg.num_classes
    keys = jax.random.split(key, 12)
    s = 1.0 / jnp.sqrt(H)

    emb_tbl = jax.random.normal(keys[0], (cfg.vocab_size, E), jnp.float32) * 0.1
    emb_tbl = emb_tbl.at[0].set(0.0)   # padding_idx = 0

    def u(k, shape):
        return jax.random.uniform(k, shape, jnp.float32, -s, s)

    return dict(
        embedding=emb_tbl,
        # forward direction (PyTorch gate order i,f,g,o); biases are b_ih + b_hh combined
        wih_f=u(keys[1], (E, 4 * H)),
        whh_f=u(keys[2], (H, 4 * H)),
        b_f=u(keys[3], (1, 4 * H)) + u(keys[4], (1, 4 * H)),
        # backward direction
        wih_b=u(keys[5], (E, 4 * H)),
        whh_b=u(keys[6], (H, 4 * H)),
        b_b=u(keys[7], (1, 4 * H)) + u(keys[8], (1, 4 * H)),
        # fc: Linear(2H, C), stored as (2H, C) for right-multiply
        wfc=u(keys[9], (2 * H, C)),
        bfc=u(keys[10], (1, C)),
    )


# ----------------------------- main ------------------------------------------
if __name__ == "__main__":
    cfg = Config()
    B, T = 2, 8

    key = jax.random.PRNGKey(0)
    k_ids, k_params = jax.random.split(key)

    x_ids = jax.random.randint(k_ids, (B, T), 0, cfg.vocab_size, dtype=jnp.int32)
    params = init_params(cfg, k_params)
    packed = pack_params(params, cfg)

    out = text_rnn_forward(x_ids, packed, cfg)
    jax.block_until_ready(out)

    assert out.shape == (B, cfg.num_classes)
    assert out.dtype == jnp.float32

    # correctness vs. f32 pure-JAX reference (bf16 MXU inputs -> loose tolerance)
    ref = text_rnn_reference(x_ids, params, cfg)
    assert jnp.allclose(out, ref, atol=3e-2, rtol=3e-2), (out, ref)

    print("KERNEL_OK")
</pallas_src>

<mosaic_0001>
module attributes {stable_mosaic.version = 11 : i64} {
  func.func @lstm_fc_kernel(%arg0: memref<2x8xi32, #tpu.memory_space<smem>>, %arg1: memref<50x32xf32, #tpu.memory_space<vmem>>, %arg2: memref<64x256xbf16, #tpu.memory_space<vmem>>, %arg3: memref<1x256xf32, #tpu.memory_space<vmem>>, %arg4: memref<64x256xbf16, #tpu.memory_space<vmem>>, %arg5: memref<64x128xbf16, #tpu.memory_space<vmem>>, %arg6: memref<1x128xf32, #tpu.memory_space<vmem>>, %arg7: memref<2x128xf32, #tpu.memory_space<vmem>>, %arg8: memref<16x64xf32, #tpu.memory_space<vmem>>) attributes {dimension_semantics = [], scalar_prefetch = 0 : i64, scratch_operands = 1 : i64, tpu.core_type = #tpu.core_type<tc>} {
    %c0 = arith.constant 0 : index
    %c0_0 = arith.constant 0 : index
    %0 = memref.load %arg0[%c0, %c0_0] : memref<2x8xi32, #tpu.memory_space<smem>>
    %1 = arith.index_cast %0 : i32 to index
    %c0_1 = arith.constant 0 : index
    %2 = vector.load %arg1[%1, %c0_1] : memref<50x32xf32, #tpu.memory_space<vmem>>, vector<1x32xf32>
    %c0_2 = arith.constant 0 : index
    %c0_3 = arith.constant 0 : index
    %3 = vector.load %arg8[%c0_2, %c0_3] : memref<16x64xf32, #tpu.memory_space<vmem>>, vector<1x32xf32>
    tpu.vector_store %arg8[%c0_2, %c0_3], %2 {strides = array<i32>} : memref<16x64xf32, #tpu.memory_space<vmem>>, vector<1x32xf32>,
    %c14 = arith.constant 14 : index
    %c32 = arith.constant 32 : index
    %4 = vector.load %arg8[%c14, %c32] : memref<16x64xf32, #tpu.memory_space<vmem>>, vector<1x32xf32>
    tpu.vector_store %arg8[%c14, %c32], %2 {strides = array<i32>} : memref<16x64xf32, #tpu.memory_space<vmem>>, vector<1x32xf32>,
    %c1 = arith.constant 1 : index
    %c0_4 = arith.constant 0 : index
    %5 = memref.load %arg0[%c1, %c0_4] : memref<2x8xi32, #tpu.memory_space<smem>>
    %6 = arith.index_cast %5 : i32 to index
    %c0_5 = arith.constant 0 : index
    %7 = vector.load %arg1[%6, %c0_5] : memref<50x32xf32, #tpu.memory_space<vmem>>, vector<1x32xf32>
    %c1_6 = arith.constant 1 : index
    %c0_7 = arith.constant 0 : index
    %8 = vector.load %arg8[%c1_6, %c0_7] : memref<16x64xf32, #tpu.memory_space<vmem>>, vector<1x32xf32>
    tpu.vector_store %arg8[%c1_6, %c0_7], %7 {strides = array<i32>} : memref<16x64xf32, #tpu.memory_space<vmem>>, vector<1x32xf32>,
    %c15 = arith.constant 15 : index
    %c32_8 = arith.constant 32 : index
    %9 = vector.load %arg8[%c15, %c32_8] : memref<16x64xf32, #tpu.memory_space<vmem>>, vector<1x32xf32>
    tpu.vector_store %arg8[%c15, %c32_8], %7 {strides = array<i32>} : memref<16x64xf32, #tpu.memory_space<vmem>>, vector<1x32xf32>,
    %c0_9 = arith.constant 0 : index
    %c1_10 = arith.constant 1 : index
    %10 = memref.load %arg0[%c0_9, %c1_10] : memref<2x8xi32, #tpu.memory_space<smem>>
    %11 = arith.index_cast %10 : i32 to index
    %c0_11 = arith.constant 0 : index
    %12 = vector.load %arg1[%11, %c0_11] : memref<50x32xf32, #tpu.memory_space<vmem>>, vector<1x32xf32>
    %c2 = arith.constant 2 : index
    %c0_12 = arith.constant 0 : index
    %13 = vector.load %arg8[%c2, %c0_12] : memref<16x64xf32, #tpu.memory_space<vmem>>, vector<1x32xf32>
    tpu.vector_store %arg8[%c2, %c0_12], %12 {strides = array<i32>} : memref<16x64xf32, #tpu.memory_space<vmem>>, vector<1x32xf32>,
    %c12 = arith.constant 12 : index
    %c32_13 = arith.constant 32 : index
    %14 = vector.load %arg8[%c12, %c32_13] : memref<16x64xf32, #tpu.memory_space<vmem>>, vector<1x32xf32>
    tpu.vector_store %arg8[%c12, %c32_13], %12 {strides = array<i32>} : memref<16x64xf32, #tpu.memory_space<vmem>>, vector<1x32xf32>,
    %c1_14 = arith.constant 1 : index
    %c1_15 = arith.constant 1 : index
    %15 = memref.load %arg0[%c1_14, %c1_15] : memref<2x8xi32, #tpu.memory_space<smem>>
    %16 = arith.index_cast %15 : i32 to index
    %c0_16 = arith.constant 0 : index
    %17 = vector.load %arg1[%16, %c0_16] : memref<50x32xf32, #tpu.memory_space<vmem>>, vector<1x32xf32>
    %c3 = arith.constant 3 : index
    %c0_17 = arith.constant 0 : index
    %18 = vector.load %arg8[%c3, %c0_17] : memref<16x64xf32, #tpu.memory_space<vmem>>, vector<1x32xf32>
    tpu.vector_store %arg8[%c3, %c0_17], %17 {strides = array<i32>} : memref<16x64xf32, #tpu.memory_space<vmem>>, vector<1x32xf32>,
    %c13 = arith.constant 13 : index
    %c32_18 = arith.constant 32 : index
    %19 = vector.load %arg8[%c13, %c32_18] : memref<16x64xf32, #tpu.memory_space<vmem>>, vector<1x32xf32>
    tpu.vector_store %arg8[%c13, %c32_18], %17 {strides = array<i32>} : memref<16x64xf32, #tpu.memory_space<vmem>>, vector<1x32xf32>,
    %c0_19 = arith.constant 0 : index
    %c2_20 = arith.constant 2 : index
    %20 = memref.load %arg0[%c0_19, %c2_20] : memref<2x8xi32, #tpu.memory_space<smem>>
    %21 = arith.index_cast %20 : i32 to index
    %c0_21 = arith.constant 0 : index
    %22 = vector.load %arg1[%21, %c0_21] : memref<50x32xf32, #tpu.memory_space<vmem>>, vector<1x32xf32>
    %c4 = arith.constant 4 : index
    %c0_22 = arith.constant 0 : index
    %23 = vector.load %arg8[%c4, %c0_22] : memref<16x64xf32, #tpu.memory_space<vmem>>, vector<1x32xf32>
    tpu.vector_store %arg8[%c4, %c0_22], %22 {strides = array<i32>} : memref<16x64xf32, #tpu.memory_space<vmem>>, vector<1x32xf32>,
    %c10 = arith.constant 10 : index
    %c32_23 = arith.constant 32 : index
    %24 = vector.load %arg8[%c10, %c32_23] : memref<16x64xf32, #tpu.memory_space<vmem>>, vector<1x32xf32>
    tpu.vector_store %arg8[%c10, %c32_23], %22 {strides = array<i32>} : memref<16x64xf32, #tpu.memory_space<vmem>>, vector<1x32xf32>,
    %c1_24 = arith.constant 1 : index
    %c2_25 = arith.constant 2 : index
    %25 = memref.load %arg0[%c1_24, %c2_25] : memref<2x8xi32, #tpu.memory_space<smem>>
    %26 = arith.index_cast %25 : i32 to index
    %c0_26 = arith.constant 0 : index
    %27 = vector.load %arg1[%26, %c0_26] : memref<50x32xf32, #tpu.memory_space<vmem>>, vector<1x32xf32>
    %c5 = arith.constant 5 : index
    %c0_27 = arith.constant 0 : index
    %28 = vector.load %arg8[%c5, %c0_27] : memref<16x64xf32, #tpu.memory_space<vmem>>, vector<1x32xf32>
    tpu.vector_store %arg8[%c5, %c0_27], %27 {strides = array<i32>} : memref<16x64xf32, #tpu.memory_space<vmem>>, vector<1x32xf32>,
    %c11 = arith.constant 11 : index
    %c32_28 = arith.constant 32 : index
    %29 = vector.load %arg8[%c11, %c32_28] : memref<16x64xf32, #tpu.memory_space<vmem>>, vector<1x32xf32>
    tpu.vector_store %arg8[%c11, %c32_28], %27 {strides = array<i32>} : memref<16x64xf32, #tpu.memory_space<vmem>>, vector<1x32xf32>,
    %c0_29 = arith.constant 0 : index
    %c3_30 = arith.constant 3 : index
    %30 = memref.load %arg0[%c0_29, %c3_30] : memref<2x8xi32, #tpu.memory_space<smem>>
    %31 = arith.index_cast %30 : i32 to index
    %c0_31 = arith.constant 0 : index
    %32 = vector.load %arg1[%31, %c0_31] : memref<50x32xf32, #tpu.memory_space<vmem>>, vector<1x32xf32>
    %c6 = arith.constant 6 : index
    %c0_32 = arith.constant 0 : index
    %33 = vector.load %arg8[%c6, %c0_32] : memref<16x64xf32, #tpu.memory_space<vmem>>, vector<1x32xf32>
    tpu.vector_store %arg8[%c6, %c0_32], %32 {strides = array<i32>} : memref<16x64xf32, #tpu.memory_space<vmem>>, vector<1x32xf32>,
    %c8 = arith.constant 8 : index
    %c32_33 = arith.constant 32 : index
    %34 = vector.load %arg8[%c8, %c32_33] : memref<16x64xf32, #tpu.memory_space<vmem>>, vector<1x32xf32>
    tpu.vector_store %arg8[%c8, %c32_33], %32 {strides = array<i32>} : memref<16x64xf32, #tpu.memory_space<vmem>>, vector<1x32xf32>,
    %c1_34 = arith.constant 1 : index
    %c3_35 = arith.constant 3 : index
    %35 = memref.load %arg0[%c1_34, %c3_35] : memref<2x8xi32, #tpu.memory_space<smem>>
    %36 = arith.index_cast %35 : i32 to index
    %c0_36 = arith.constant 0 : index
    %37 = vector.load %arg1[%36, %c0_36] : memref<50x32xf32, #tpu.memory_space<vmem>>, vector<1x32xf32>
    %c7 = arith.constant 7 : index
    %c0_37 = arith.constant 0 : index
    %38 = vector.load %arg8[%c7, %c0_37] : memref<16x64xf32, #tpu.memory_space<vmem>>, vector<1x32xf32>
    tpu.vector_store %arg8[%c7, %c0_37], %37 {strides = array<i32>} : memref<16x64xf32, #tpu.memory_space<vmem>>, vector<1x32xf32>,
    %c9 = arith.constant 9 : index
    %c32_38 = arith.constant 32 : index
    %39 = vector.load %arg8[%c9, %c32_38] : memref<16x64xf32, #tpu.memory_space<vmem>>, vector<1x32xf32>
    tpu.vector_store %arg8[%c9, %c32_38], %37 {strides = array<i32>} : memref<16x64xf32, #tpu.memory_space<vmem>>, vector<1x32xf32>,
    %c0_39 = arith.constant 0 : index
    %c4_40 = arith.constant 4 : index
    %40 = memref.load %arg0[%c0_39, %c4_40] : memref<2x8xi32, #tpu.memory_space<smem>>
    %41 = arith.index_cast %40 : i32 to index
    %c0_41 = arith.constant 0 : index
    %42 = vector.load %arg1[%41, %c0_41] : memref<50x32xf32, #tpu.memory_space<vmem>>, vector<1x32xf32>
    %c8_42 = arith.constant 8 : index
    %c0_43 = arith.constant 0 : index
    %43 = vector.load %arg8[%c8_42, %c0_43] : memref<16x64xf32, #tpu.memory_space<vmem>>, vector<1x32xf32>
    tpu.vector_store %arg8[%c8_42, %c0_43], %42 {strides = array<i32>} : memref<16x64xf32, #tpu.memory_space<vmem>>, vector<1x32xf32>,
    %c6_44 = arith.constant 6 : index
    %c32_45 = arith.constant 32 : index
    %44 = vector.load %arg8[%c6_44, %c32_45] : memref<16x64xf32, #tpu.memory_space<vmem>>, vector<1x32xf32>
    tpu.vector_store %arg8[%c6_44, %c32_45], %42 {strides = array<i32>} : memref<16x64xf32, #tpu.memory_space<vmem>>, vector<1x32xf32>,
    %c1_46 = arith.constant 1 : index
    %c4_47 = arith.constant 4 : index
    %45 = memref.load %arg0[%c1_46, %c4_47] : memref<2x8xi32, #tpu.memory_space<smem>>
    %46 = arith.index_cast %45 : i32 to index
    %c0_48 = arith.constant 0 : index
    %47 = vector.load %arg1[%46, %c0_48] : memref<50x32xf32, #tpu.memory_space<vmem>>, vector<1x32xf32>
    %c9_49 = arith.constant 9 : index
    %c0_50 = arith.constant 0 : index
    %48 = vector.load %arg8[%c9_49, %c0_50] : memref<16x64xf32, #tpu.memory_space<vmem>>, vector<1x32xf32>
    tpu.vector_store %arg8[%c9_49, %c0_50], %47 {strides = array<i32>} : memref<16x64xf32, #tpu.memory_space<vmem>>, vector<1x32xf32>,
    %c7_51 = arith.constant 7 : index
    %c32_52 = arith.constant 32 : index
    %49 = vector.load %arg8[%c7_51, %c32_52] : memref<16x64xf32, #tpu.memory_space<vmem>>, vector<1x32xf32>
    tpu.vector_store %arg8[%c7_51, %c32_52], %47 {strides = array<i32>} : memref<16x64xf32, #tpu.memory_space<vmem>>, vector<1x32xf32>,
    %c0_53 = arith.constant 0 : index
    %c5_54 = arith.constant 5 : index
    %50 = memref.load %arg0[%c0_53, %c5_54] : memref<2x8xi32, #tpu.memory_space<smem>>
    %51 = arith.index_cast %50 : i32 to index
    %c0_55 = arith.constant 0 : index
    %52 = vector.load %arg1[%51, %c0_55] : memref<50x32xf32, #tpu.memory_space<vmem>>, vector<1x32xf32>
    %c10_56 = arith.constant 10 : index
    %c0_57 = arith.constant 0 : index
    %53 = vector.load %arg8[%c10_56, %c0_57] : memref<16x64xf32, #tpu.memory_space<vmem>>, vector<1x32xf32>
    tpu.vector_store %arg8[%c10_56, %c0_57], %52 {strides = array<i32>} : memref<16x64xf32, #tpu.memory_space<vmem>>, vector<1x32xf32>,
    %c4_58 = arith.constant 4 : index
    %c32_59 = arith.constant 32 : index
    %54 = vector.load %arg8[%c4_58, %c32_59] : memref<16x64xf32, #tpu.memory_space<vmem>>, vector<1x32xf32>
    tpu.vector_store %arg8[%c4_58, %c32_59], %52 {strides = array<i32>} : memref<16x64xf32, #tpu.memory_space<vmem>>, vector<1x32xf32>,
    %c1_60 = arith.constant 1 : index
    %c5_61 = arith.constant 5 : index
    %55 = memref.load %arg0[%c1_60, %c5_61] : memref<2x8xi32, #tpu.memory_space<smem>>
    %56 = arith.index_cast %55 : i32 to index
    %c0_62 = arith.constant 0 : index
    %57 = vector.load %arg1[%56, %c0_62] : memref<50x32xf32, #tpu.memory_space<vmem>>, vector<1x32xf32>
    %c11_63 = arith.constant 11 : index
    %c0_64 = arith.constant 0 : index
    %58 = vector.load %arg8[%c11_63, %c0_64] : memref<16x64xf32, #tpu.memory_space<vmem>>, vector<1x32xf32>
    tpu.vector_store %arg8[%c11_63, %c0_64], %57 {strides = array<i32>} : memref<16x64xf32, #tpu.memory_space<vmem>>, vector<1x32xf32>,
    %c5_65 = arith.constant 5 : index
    %c32_66 = arith.constant 32 : index
    %59 = vector.load %arg8[%c5_65, %c32_66] : memref<16x64xf32, #tpu.memory_space<vmem>>, vector<1x32xf32>
    tpu.vector_store %arg8[%c5_65, %c32_66], %57 {strides = array<i32>} : memref<16x64xf32, #tpu.memory_space<vmem>>, vector<1x32xf32>,
    %c0_67 = arith.constant 0 : index
    %c6_68 = arith.constant 6 : index
    %60 = memref.load %arg0[%c0_67, %c6_68] : memref<2x8xi32, #tpu.memory_space<smem>>
    %61 = arith.index_cast %60 : i32 to index
    %c0_69 = arith.constant 0 : index
    %62 = vector.load %arg1[%61, %c0_69] : memref<50x32xf32, #tpu.memory_space<vmem>>, vector<1x32xf32>
    %c12_70 = arith.constant 12 : index
    %c0_71 = arith.constant 0 : index
    %63 = vector.load %arg8[%c12_70, %c0_71] : memref<16x64xf32, #tpu.memory_space<vmem>>, vector<1x32xf32>
    tpu.vector_store %arg8[%c12_70, %c0_71], %62 {strides = array<i32>} : memref<16x64xf32, #tpu.memory_space<vmem>>, vector<1x32xf32>,
    %c2_72 = arith.constant 2 : index
    %c32_73 = arith.constant 32 : index
    %64 = vector.load %arg8[%c2_72, %c32_73] : memref<16x64xf32, #tpu.memory_space<vmem>>, vector<1x32xf32>
    tpu.vector_store %arg8[%c2_72, %c32_73], %62 {strides = array<i32>} : memref<16x64xf32, #tpu.memory_space<vmem>>, vector<1x32xf32>,
    %c1_74 = arith.constant 1 : index
    %c6_75 = arith.constant 6 : index
    %65 = memref.load %arg0[%c1_74, %c6_75] : memref<2x8xi32, #tpu.memory_space<smem>>
    %66 = arith.index_cast %65 : i32 to index
    %c0_76 = arith.constant 0 : index
    %67 = vector.load %arg1[%66, %c0_76] : memref<50x32xf32, #tpu.memory_space<vmem>>, vector<1x32xf32>
    %c13_77 = arith.constant 13 : index
    %c0_78 = arith.constant 0 : index
    %68 = vector.load %arg8[%c13_77, %c0_78] : memref<16x64xf32, #tpu.memory_space<vmem>>, vector<1x32xf32>
    tpu.vector_store %arg8[%c13_77, %c0_78], %67 {strides = array<i32>} : memref<16x64xf32, #tpu.memory_space<vmem>>, vector<1x32xf32>,
    %c3_79 = arith.constant 3 : index
    %c32_80 = arith.constant 32 : index
    %69 = vector.load %arg8[%c3_79, %c32_80] : memref<16x64xf32, #tpu.memory_space<vmem>>, vector<1x32xf32>
    tpu.vector_store %arg8[%c3_79, %c32_80], %67 {strides = array<i32>} : memref<16x64xf32, #tpu.memory_space<vmem>>, vector<1x32xf32>,
    %c0_81 = arith.constant 0 : index
    %c7_82 = arith.constant 7 : index
    %70 = memref.load %arg0[%c0_81, %c7_82] : memref<2x8xi32, #tpu.memory_space<smem>>
    %71 = arith.index_cast %70 : i32 to index
    %c0_83 = arith.constant 0 : index
    %72 = vector.load %arg1[%71, %c0_83] : memref<50x32xf32, #tpu.memory_space<vmem>>, vector<1x32xf32>
    %c14_84 = arith.constant 14 : index
    %c0_85 = arith.constant 0 : index
    %73 = vector.load %arg8[%c14_84, %c0_85] : memref<16x64xf32, #tpu.memory_space<vmem>>, vector<1x32xf32>
    tpu.vector_store %arg8[%c14_84, %c0_85], %72 {strides = array<i32>} : memref<16x64xf32, #tpu.memory_space<vmem>>, vector<1x32xf32>,
    %c0_86 = arith.constant 0 : index
    %c32_87 = arith.constant 32 : index
    %74 = vector.load %arg8[%c0_86, %c32_87] : memref<16x64xf32, #tpu.memory_space<vmem>>, vector<1x32xf32>
    tpu.vector_store %arg8[%c0_86, %c32_87], %72 {strides = array<i32>} : memref<16x64xf32, #tpu.memory_space<vmem>>, vector<1x32xf32>,
    %c1_88 = arith.constant 1 : index
    %c7_89 = arith.constant 7 : index
    %75 = memref.load %arg0[%c1_88, %c7_89] : memref<2x8xi32, #tpu.memory_space<smem>>
    %76 = arith.index_cast %75 : i32 to index
    %c0_90 = arith.constant 0 : index
    %77 = vector.load %arg1[%76, %c0_90] : memref<50x32xf32, #tpu.memory_space<vmem>>, vector<1x32xf32>
    %c15_91 = arith.constant 15 : index
    %c0_92 = arith.constant 0 : index
    %78 = vector.load %arg8[%c15_91, %c0_92] : memref<16x64xf32, #tpu.memory_space<vmem>>, vector<1x32xf32>
    tpu.vector_store %arg8[%c15_91, %c0_92], %77 {strides = array<i32>} : memref<16x64xf32, #tpu.memory_space<vmem>>, vector<1x32xf32>,
    %c1_93 = arith.constant 1 : index
    %c32_94 = arith.constant 32 : index
    %79 = vector.load %arg8[%c1_93, %c32_94] : memref<16x64xf32, #tpu.memory_space<vmem>>, vector<1x32xf32>
    tpu.vector_store %arg8[%c1_93, %c32_94], %77 {strides = array<i32>} : memref<16x64xf32, #tpu.memory_space<vmem>>, vector<1x32xf32>,
    %c0_95 = arith.constant 0 : index
    %c0_96 = arith.constant 0 : index
    %80 = vector.load %arg8[%c0_95, %c0_96] : memref<16x64xf32, #tpu.memory_space<vmem>>, vector<16x64xf32>
    %81 = arith.truncf %80 : vector<16x64xf32> to vector<16x64xbf16>
    %c0_97 = arith.constant 0 : index
    %c0_98 = arith.constant 0 : index
    %82 = vector.load %arg2[%c0_97, %c0_98] : memref<64x256xbf16, #tpu.memory_space<vmem>>, vector<64x256xbf16>
    %cst = arith.constant dense<0.000000e+00> : vector<16x256xf32>
    %83 = tpu.matmul %81, %82, %cst {dimension_numbers = #tpu.dot_dimension_numbers<[1], [0], [0], [1], [0, 0, 1, 1], [], []>} : vector<16x64xbf16>, vector<64x256xbf16>, vector<16x256xf32> -> vector<16x256xf32>
    %c0_99 = arith.constant 0 : index
    %c0_100 = arith.constant 0 : index
    %84 = vector.load %arg3[%c0_99, %c0_100] : memref<1x256xf32, #tpu.memory_space<vmem>>, vector<1x256xf32>
    %85 = vector.broadcast %84 : vector<1x256xf32> to vector<16x256xf32>
    %86 = arith.addf %83, %85 : vector<16x256xf32>
    %c0_101 = arith.constant 0 : index
    %c0_102 = arith.constant 0 : index
    %87 = vector.load %arg4[%c0_101, %c0_102] : memref<64x256xbf16, #tpu.memory_space<vmem>>, vector<64x256xbf16>
    %cst_103 = arith.constant 0.000000e+00 : bf16
    %88 = vector.broadcast %cst_103 : bf16 to vector<2x64xbf16>
    %cst_104 = arith.constant 0.000000e+00 : f32
    %89 = vector.broadcast %cst_104 : f32 to vector<2x64xf32>
    %90 = vector.extract_strided_slice %86 {offsets = [0, 0], sizes = [2, 256], strides = [1, 1]} : vector<16x256xf32> to vector<2x256xf32>
    %cst_105 = arith.constant dense<0.000000e+00> : vector<2x256xf32>
    %91 = tpu.matmul %88, %87, %cst_105 {dimension_numbers = #tpu.dot_dimension_numbers<[1], [0], [0], [1], [0, 0, 1, 1], [], []>} : vector<2x64xbf16>, vector<64x256xbf16>, vector<2x256xf32> -> vector<2x256xf32>
    %92 = arith.addf %90, %91 : vector<2x256xf32>
    %93 = vector.extract_strided_slice %92 {offsets = [0, 0], sizes = [2, 128], strides = [1, 1]} : vector<2x256xf32> to vector<2x128xf32>
    %94 = arith.negf %93 : vector<2x128xf32>
    %95 = math.exp %94 : vector<2x128xf32>
    %cst_106 = arith.constant 1.000000e+00 : f32
    %96 = vector.broadcast %cst_106 : f32 to vector<2x128xf32>
    %97 = arith.addf %96, %95 : vector<2x128xf32>
    %98 = arith.divf %96, %97 : vector<2x128xf32>
    %99 = vector.extract_strided_slice %92 {offsets = [0, 128], sizes = [2, 64], strides = [1, 1]} : vector<2x256xf32> to vector<2x64xf32>
    %100 = math.tanh %99 : vector<2x64xf32>
    %101 = vector.extract_strided_slice %92 {offsets = [0, 192], sizes = [2, 64], strides = [1, 1]} : vector<2x256xf32> to vector<2x64xf32>
    %102 = arith.negf %101 : vector<2x64xf32>
    %103 = math.exp %102 : vector<2x64xf32>
    %cst_107 = arith.constant 1.000000e+00 : f32
    %104 = vector.broadcast %cst_107 : f32 to vector<2x64xf32>
    %105 = arith.addf %104, %103 : vector<2x64xf32>
    %106 = arith.divf %104, %105 : vector<2x64xf32>
    %107 = vector.extract_strided_slice %98 {offsets = [0, 64], sizes = [2, 64], strides = [1, 1]} : vector<2x128xf32> to vector<2x64xf32>
    %108 = arith.mulf %107, %89 : vector<2x64xf32>
    %109 = vector.extract_strided_slice %98 {offsets = [0, 0], sizes = [2, 64], strides = [1, 1]} : vector<2x128xf32> to vector<2x64xf32>
    %110 = arith.mulf %109, %100 : vector<2x64xf32>
    %111 = arith.addf %108, %110 : vector<2x64xf32>
    %112 = math.tanh %111 : vector<2x64xf32>
    %113 = arith.mulf %106, %112 : vector<2x64xf32>
    %114 = arith.truncf %113 : vector<2x64xf32> to vector<2x64xbf16>
    %115 = vector.extract_strided_slice %86 {offsets = [2, 0], sizes = [2, 256], strides = [1, 1]} : vector<16x256xf32> to vector<2x256xf32>
    %cst_108 = arith.constant dense<0.000000e+00> : vector<2x256xf32>
    %116 = tpu.matmul %114, %87, %cst_108 {dimension_numbers = #tpu.dot_dimension_numbers<[1], [0], [0], [1], [0, 0, 1, 1], [], []>} : vector<2x64xbf16>, vector<64x256xbf16>, vector<2x256xf32> -> vector<2x256xf32>
    %117 = arith.addf %115, %116 : vector<2x256xf32>
    %118 = vector.extract_strided_slice %117 {offsets = [0, 0], sizes = [2, 128], strides = [1, 1]} : vector<2x256xf32> to vector<2x128xf32>
    %119 = arith.negf %118 : vector<2x128xf32>
    %120 = math.exp %119 : vector<2x128xf32>
    %cst_109 = arith.constant 1.000000e+00 : f32
    %121 = vector.broadcast %cst_109 : f32 to vector<2x128xf32>
    %122 = arith.addf %121, %120 : vector<2x128xf32>
    %123 = arith.divf %121, %122 : vector<2x128xf32>
    %124 = vector.extract_strided_slice %117 {offsets = [0, 128], sizes = [2, 64], strides = [1, 1]} : vector<2x256xf32> to vector<2x64xf32>
    %125 = math.tanh %124 : vector<2x64xf32>
    %126 = vector.extract_strided_slice %117 {offsets = [0, 192], sizes = [2, 64], strides = [1, 1]} : vector<2x256xf32> to vector<2x64xf32>
    %127 = arith.negf %126 : vector<2x64xf32>
    %128 = math.exp %127 : vector<2x64xf32>
    %cst_110 = arith.constant 1.000000e+00 : f32
    %129 = vector.broadcast %cst_110 : f32 to vector<2x64xf32>
    %130 = arith.addf %129, %128 : vector<2x64xf32>
    %131 = arith.divf %129, %130 : vector<2x64xf32>
    %132 = vector.extract_strided_slice %123 {offsets = [0, 64], sizes = [2, 64], strides = [1, 1]} : vector<2x128xf32> to vector<2x64xf32>
    %133 = arith.mulf %132, %111 : vector<2x64xf32>
    %134 = vector.extract_strided_slice %123 {offsets = [0, 0], sizes = [2, 64], strides = [1, 1]} : vector<2x128xf32> to vector<2x64xf32>
    %135 = arith.mulf %134, %125 : vector<2x64xf32>
    %136 = arith.addf %133, %135 : vector<2x64xf32>
    %137 = math.tanh %136 : vector<2x64xf32>
    %138 = arith.mulf %131, %137 : vector<2x64xf32>
    %139 = arith.truncf %138 : vector<2x64xf32> to vector<2x64xbf16>
    %140 = vector.extract_strided_slice %86 {offsets = [4, 0], sizes = [2, 256], strides = [1, 1]} : vector<16x256xf32> to vector<2x256xf32>
    %cst_111 = arith.constant dense<0.000000e+00> : vector<2x256xf32>
    %141 = tpu.matmul %139, %87, %cst_111 {dimension_numbers = #tpu.dot_dimension_numbers<[1], [0], [0], [1], [0, 0, 1, 1], [], []>} : vector<2x64xbf16>, vector<64x256xbf16>, vector<2x256xf32> -> vector<2x256xf32>
    %142 = arith.addf %140, %141 : vector<2x256xf32>
    %143 = vector.extract_strided_slice %142 {offsets = [0, 0], sizes = [2, 128], strides = [1, 1]} : vector<2x256xf32> to vector<2x128xf32>
    %144 = arith.negf %143 : vector<2x128xf32>
    %145 = math.exp %144 : vector<2x128xf32>
    %cst_112 = arith.constant 1.000000e+00 : f32
    %146 = vector.broadcast %cst_112 : f32 to vector<2x128xf32>
    %147 = arith.addf %146, %145 : vector<2x128xf32>
    %148 = arith.divf %146, %147 : vector<2x128xf32>
    %149 = vector.extract_strided_slice %142 {offsets = [0, 128], sizes = [2, 64], strides = [1, 1]} : vector<2x256xf32> to vector<2x64xf32>
    %150 = math.tanh %149 : vector<2x64xf32>
    %151 = vector.extract_strided_slice %142 {offsets = [0, 192], sizes = [2, 64], strides = [1, 1]} : vector<2x256xf32> to vector<2x64xf32>
    %152 = arith.negf %151 : vector<2x64xf32>
    %153 = math.exp %152 : vector<2x64xf32>
    %cst_113 = arith.constant 1.000000e+00 : f32
    %154 = vector.broadcast %cst_113 : f32 to vector<2x64xf32>
    %155 = arith.addf %154, %153 : vector<2x64xf32>
    %156 = arith.divf %154, %155 : vector<2x64xf32>
    %157 = vector.extract_strided_slice %148 {offsets = [0, 64], sizes = [2, 64], strides = [1, 1]} : vector<2x128xf32> to vector<2x64xf32>
    %158 = arith.mulf %157, %136 : vector<2x64xf32>
    %159 = vector.extract_strided_slice %148 {offsets = [0, 0], sizes = [2, 64], strides = [1, 1]} : vector<2x128xf32> to vector<2x64xf32>
    %160 = arith.mulf %159, %150 : vector<2x64xf32>
    %161 = arith.addf %158, %160 : vector<2x64xf32>
    %162 = math.tanh %161 : vector<2x64xf32>
    %163 = arith.mulf %156, %162 : vector<2x64xf32>
    %164 = arith.truncf %163 : vector<2x64xf32> to vector<2x64xbf16>
    %165 = vector.extract_strided_slice %86 {offsets = [6, 0], sizes = [2, 256], strides = [1, 1]} : vector<16x256xf32> to vector<2x256xf32>
    %cst_114 = arith.constant dense<0.000000e+00> : vector<2x256xf32>
    %166 = tpu.matmul %164, %87, %cst_114 {dimension_numbers = #tpu.dot_dimension_numbers<[1], [0], [0], [1], [0, 0, 1, 1], [], []>} : vector<2x64xbf16>, vector<64x256xbf16>, vector<2x256xf32> -> vector<2x256xf32>
    %167 = arith.addf %165, %166 : vector<2x256xf32>
    %168 = vector.extract_strided_slice %167 {offsets = [0, 0], sizes = [2, 128], strides = [1, 1]} : vector<2x256xf32> to vector<2x128xf32>
    %169 = arith.negf %168 : vector<2x128xf32>
    %170 = math.exp %169 : vector<2x128xf32>
    %cst_115 = arith.constant 1.000000e+00 : f32
    %171 = vector.broadcast %cst_115 : f32 to vector<2x128xf32>
    %172 = arith.addf %171, %170 : vector<2x128xf32>
    %173 = arith.divf %171, %172 : vector<2x128xf32>
    %174 = vector.extract_strided_slice %167 {offsets = [0, 128], sizes = [2, 64], strides = [1, 1]} : vector<2x256xf32> to vector<2x64xf32>
    %175 = math.tanh %174 : vector<2x64xf32>
    %176 = vector.extract_strided_slice %167 {offsets = [0, 192], sizes = [2, 64], strides = [1, 1]} : vector<2x256xf32> to vector<2x64xf32>
    %177 = arith.negf %176 : vector<2x64xf32>
    %178 = math.exp %177 : vector<2x64xf32>
    %cst_116 = arith.constant 1.000000e+00 : f32
    %179 = vector.broadcast %cst_116 : f32 to vector<2x64xf32>
    %180 = arith.addf %179, %178 : vector<2x64xf32>
    %181 = arith.divf %179, %180 : vector<2x64xf32>
    %182 = vector.extract_strided_slice %173 {offsets = [0, 64], sizes = [2, 64], strides = [1, 1]} : vector<2x128xf32> to vector<2x64xf32>
    %183 = arith.mulf %182, %161 : vector<2x64xf32>
    %184 = vector.extract_strided_slice %173 {offsets = [0, 0], sizes = [2, 64], strides = [1, 1]} : vector<2x128xf32> to vector<2x64xf32>
    %185 = arith.mulf %184, %175 : vector<2x64xf32>
    %186 = arith.addf %183, %185 : vector<2x64xf32>
    %187 = math.tanh %186 : vector<2x64xf32>
    %188 = arith.mulf %181, %187 : vector<2x64xf32>
    %189 = arith.truncf %188 : vector<2x64xf32> to vector<2x64xbf16>
    %190 = vector.extract_strided_slice %86 {offsets = [8, 0], sizes = [2, 256], strides = [1, 1]} : vector<16x256xf32> to vector<2x256xf32>
    %cst_117 = arith.constant dense<0.000000e+00> : vector<2x256xf32>
    %191 = tpu.matmul %189, %87, %cst_117 {dimension_numbers = #tpu.dot_dimension_numbers<[1], [0], [0], [1], [0, 0, 1, 1], [], []>} : vector<2x64xbf16>, vector<64x256xbf16>, vector<2x256xf32> -> vector<2x256xf32>
    %192 = arith.addf %190, %191 : vector<2x256xf32>
    %193 = vector.extract_strided_slice %192 {offsets = [0, 0], sizes = [2, 128], strides = [1, 1]} : vector<2x256xf32> to vector<2x128xf32>
    %194 = arith.negf %193 : vector<2x128xf32>
    %195 = math.exp %194 : vector<2x128xf32>
    %cst_118 = arith.constant 1.000000e+00 : f32
    %196 = vector.broadcast %cst_118 : f32 to vector<2x128xf32>
    %197 = arith.addf %196, %195 : vector<2x128xf32>
    %198 = arith.divf %196, %197 : vector<2x128xf32>
    %199 = vector.extract_strided_slice %192 {offsets = [0, 128], sizes = [2, 64], strides = [1, 1]} : vector<2x256xf32> to vector<2x64xf32>
    %200 = math.tanh %199 : vector<2x64xf32>
    %201 = vector.extract_strided_slice %192 {offsets = [0, 192], sizes = [2, 64], strides = [1, 1]} : vector<2x256xf32> to vector<2x64xf32>
    %202 = arith.negf %201 : vector<2x64xf32>
    %203 = math.exp %202 : vector<2x64xf32>
    %cst_119 = arith.constant 1.000000e+00 : f32
    %204 = vector.broadcast %cst_119 : f32 to vector<2x64xf32>
    %205 = arith.addf %204, %203 : vector<2x64xf32>
    %206 = arith.divf %204, %205 : vector<2x64xf32>
    %207 = vector.extract_strided_slice %198 {offsets = [0, 64], sizes = [2, 64], strides = [1, 1]} : vector<2x128xf32> to vector<2x64xf32>
    %208 = arith.mulf %207, %186 : vector<2x64xf32>
    %209 = vector.extract_strided_slice %198 {offsets = [0, 0], sizes = [2, 64], strides = [1, 1]} : vector<2x128xf32> to vector<2x64xf32>
    %210 = arith.mulf %209, %200 : vector<2x64xf32>
    %211 = arith.addf %208, %210 : vector<2x64xf32>
    %212 = math.tanh %211 : vector<2x64xf32>
    %213 = arith.mulf %206, %212 : vector<2x64xf32>
    %214 = arith.truncf %213 : vector<2x64xf32> to vector<2x64xbf16>
    %215 = vector.extract_strided_slice %86 {offsets = [10, 0], sizes = [2, 256], strides = [1, 1]} : vector<16x256xf32> to vector<2x256xf32>
    %cst_120 = arith.constant dense<0.000000e+00> : vector<2x256xf32>
    %216 = tpu.matmul %214, %87, %cst_120 {dimension_numbers = #tpu.dot_dimension_numbers<[1], [0], [0], [1], [0, 0, 1, 1], [], []>} : vector<2x64xbf16>, vector<64x256xbf16>, vector<2x256xf32> -> vector<2x256xf32>
    %217 = arith.addf %215, %216 : vector<2x256xf32>
    %218 = vector.extract_strided_slice %217 {offsets = [0, 0], sizes = [2, 128], strides = [1, 1]} : vector<2x256xf32> to vector<2x128xf32>
    %219 = arith.negf %218 : vector<2x128xf32>
    %220 = math.exp %219 : vector<2x128xf32>
    %cst_121 = arith.constant 1.000000e+00 : f32
    %221 = vector.broadcast %cst_121 : f32 to vector<2x128xf32>
    %222 = arith.addf %221, %220 : vector<2x128xf32>
    %223 = arith.divf %221, %222 : vector<2x128xf32>
    %224 = vector.extract_strided_slice %217 {offsets = [0, 128], sizes = [2, 64], strides = [1, 1]} : vector<2x256xf32> to vector<2x64xf32>
    %225 = math.tanh %224 : vector<2x64xf32>
    %226 = vector.extract_strided_slice %217 {offsets = [0, 192], sizes = [2, 64], strides = [1, 1]} : vector<2x256xf32> to vector<2x64xf32>
    %227 = arith.negf %226 : vector<2x64xf32>
    %228 = math.exp %227 : vector<2x64xf32>
    %cst_122 = arith.constant 1.000000e+00 : f32
    %229 = vector.broadcast %cst_122 : f32 to vector<2x64xf32>
    %230 = arith.addf %229, %228 : vector<2x64xf32>
    %231 = arith.divf %229, %230 : vector<2x64xf32>
    %232 = vector.extract_strided_slice %223 {offsets = [0, 64], sizes = [2, 64], strides = [1, 1]} : vector<2x128xf32> to vector<2x64xf32>
    %233 = arith.mulf %232, %211 : vector<2x64xf32>
    %234 = vector.extract_strided_slice %223 {offsets = [0, 0], sizes = [2, 64], strides = [1, 1]} : vector<2x128xf32> to vector<2x64xf32>
    %235 = arith.mulf %234, %225 : vector<2x64xf32>
    %236 = arith.addf %233, %235 : vector<2x64xf32>
    %237 = math.tanh %236 : vector<2x64xf32>
    %238 = arith.mulf %231, %237 : vector<2x64xf32>
    %239 = arith.truncf %238 : vector<2x64xf32> to vector<2x64xbf16>
    %240 = vector.extract_strided_slice %86 {offsets = [12, 0], sizes = [2, 256], strides = [1, 1]} : vector<16x256xf32> to vector<2x256xf32>
    %cst_123 = arith.constant dense<0.000000e+00> : vector<2x256xf32>
    %241 = tpu.matmul %239, %87, %cst_123 {dimension_numbers = #tpu.dot_dimension_numbers<[1], [0], [0], [1], [0, 0, 1, 1], [], []>} : vector<2x64xbf16>, vector<64x256xbf16>, vector<2x256xf32> -> vector<2x256xf32>
    %242 = arith.addf %240, %241 : vector<2x256xf32>
    %243 = vector.extract_strided_slice %242 {offsets = [0, 0], sizes = [2, 128], strides = [1, 1]} : vector<2x256xf32> to vector<2x128xf32>
    %244 = arith.negf %243 : vector<2x128xf32>
    %245 = math.exp %244 : vector<2x128xf32>
    %cst_124 = arith.constant 1.000000e+00 : f32
    %246 = vector.broadcast %cst_124 : f32 to vector<2x128xf32>
    %247 = arith.addf %246, %245 : vector<2x128xf32>
    %248 = arith.divf %246, %247 : vector<2x128xf32>
    %249 = vector.extract_strided_slice %242 {offsets = [0, 128], sizes = [2, 64], strides = [1, 1]} : vector<2x256xf32> to vector<2x64xf32>
    %250 = math.tanh %249 : vector<2x64xf32>
    %251 = vector.extract_strided_slice %242 {offsets = [0, 192], sizes = [2, 64], strides = [1, 1]} : vector<2x256xf32> to vector<2x64xf32>
    %252 = arith.negf %251 : vector<2x64xf32>
    %253 = math.exp %252 : vector<2x64xf32>
    %cst_125 = arith.constant 1.000000e+00 : f32
    %254 = vector.broadcast %cst_125 : f32 to vector<2x64xf32>
    %255 = arith.addf %254, %253 : vector<2x64xf32>
    %256 = arith.divf %254, %255 : vector<2x64xf32>
    %257 = vector.extract_strided_slice %248 {offsets = [0, 64], sizes = [2, 64], strides = [1, 1]} : vector<2x128xf32> to vector<2x64xf32>
    %258 = arith.mulf %257, %236 : vector<2x64xf32>
    %259 = vector.extract_strided_slice %248 {offsets = [0, 0], sizes = [2, 64], strides = [1, 1]} : vector<2x128xf32> to vector<2x64xf32>
    %260 = arith.mulf %259, %250 : vector<2x64xf32>
    %261 = arith.addf %258, %260 : vector<2x64xf32>
    %262 = math.tanh %261 : vector<2x64xf32>
    %263 = arith.mulf %256, %262 : vector<2x64xf32>
    %264 = arith.truncf %263 : vector<2x64xf32> to vector<2x64xbf16>
    %265 = vector.extract_strided_slice %86 {offsets = [14, 0], sizes = [2, 256], strides = [1, 1]} : vector<16x256xf32> to vector<2x256xf32>
    %cst_126 = arith.constant dense<0.000000e+00> : vector<2x256xf32>
    %266 = tpu.matmul %264, %87, %cst_126 {dimension_numbers = #tpu.dot_dimension_numbers<[1], [0], [0], [1], [0, 0, 1, 1], [], []>} : vector<2x64xbf16>, vector<64x256xbf16>, vector<2x256xf32> -> vector<2x256xf32>
    %267 = arith.addf %265, %266 : vector<2x256xf32>
    %268 = vector.extract_strided_slice %267 {offsets = [0, 0], sizes = [2, 128], strides = [1, 1]} : vector<2x256xf32> to vector<2x128xf32>
    %269 = arith.negf %268 : vector<2x128xf32>
    %270 = math.exp %269 : vector<2x128xf32>
    %cst_127 = arith.constant 1.000000e+00 : f32
    %271 = vector.broadcast %cst_127 : f32 to vector<2x128xf32>
    %272 = arith.addf %271, %270 : vector<2x128xf32>
    %273 = arith.divf %271, %272 : vector<2x128xf32>
    %274 = vector.extract_strided_slice %267 {offsets = [0, 128], sizes = [2, 64], strides = [1, 1]} : vector<2x256xf32> to vector<2x64xf32>
    %275 = math.tanh %274 : vector<2x64xf32>
    %276 = vector.extract_strided_slice %267 {offsets = [0, 192], sizes = [2, 64], strides = [1, 1]} : vector<2x256xf32> to vector<2x64xf32>
    %277 = arith.negf %276 : vector<2x64xf32>
    %278 = math.exp %277 : vector<2x64xf32>
    %cst_128 = arith.constant 1.000000e+00 : f32
    %279 = vector.broadcast %cst_128 : f32 to vector<2x64xf32>
    %280 = arith.addf %279, %278 : vector<2x64xf32>
    %281 = arith.divf %279, %280 : vector<2x64xf32>
    %282 = vector.extract_strided_slice %273 {offsets = [0, 64], sizes = [2, 64], strides = [1, 1]} : vector<2x128xf32> to vector<2x64xf32>
    %283 = arith.mulf %282, %261 : vector<2x64xf32>
    %284 = vector.extract_strided_slice %273 {offsets = [0, 0], sizes = [2, 64], strides = [1, 1]} : vector<2x128xf32> to vector<2x64xf32>
    %285 = arith.mulf %284, %275 : vector<2x64xf32>
    %286 = arith.addf %283, %285 : vector<2x64xf32>
    %287 = math.tanh %286 : vector<2x64xf32>
    %288 = arith.mulf %281, %287 : vector<2x64xf32>
    %289 = arith.truncf %288 : vector<2x64xf32> to vector<2x64xbf16>
    %c0_129 = arith.constant 0 : index
    %c0_130 = arith.constant 0 : index
    %290 = vector.load %arg5[%c0_129, %c0_130] : memref<64x128xbf16, #tpu.memory_space<vmem>>, vector<64x128xbf16>
    %cst_131 = arith.constant dense<0.000000e+00> : vector<2x128xf32>
    %291 = tpu.matmul %289, %290, %cst_131 {dimension_numbers = #tpu.dot_dimension_numbers<[1], [0], [0], [1], [0, 0, 1, 1], [], []>} : vector<2x64xbf16>, vector<64x128xbf16>, vector<2x128xf32> -> vector<2x128xf32>
    %c0_132 = arith.constant 0 : index
    %c0_133 = arith.constant 0 : index
    %292 = vector.load %arg6[%c0_132, %c0_133] : memref<1x128xf32, #tpu.memory_space<vmem>>, vector<1x128xf32>
    %293 = vector.broadcast %292 : vector<1x128xf32> to vector<2x128xf32>
    %294 = arith.addf %291, %293 : vector<2x128xf32>
    %c0_134 = arith.constant 0 : index
    %c0_135 = arith.constant 0 : index
    %295 = vector.load %arg7[%c0_134, %c0_135] : memref<2x128xf32, #tpu.memory_space<vmem>>, vector<2x128xf32>
    tpu.vector_store %arg7[%c0_134, %c0_135], %294 {strides = array<i32>} : memref<2x128xf32, #tpu.memory_space<vmem>>, vector<2x128xf32>,
    return
  }
}

</mosaic_0001>

<bundles_post_ra>
// kernel: tpu_custom_call.1
= control target key start
LH: loop header
LB: loop body
LE: loop exit
PB: predicated region body
PF: predicated region fallthrough
CT: control target
= control target key end

     0   :  { %12 = vsyncpa [#allocation6], 0  ;;  %s1799_s0 = inlined_call_operand.hbm [shape: s32[2,8], index: 0, kind: input, shape index: {}]   ;;  %s1800_s1 = inlined_call_operand.vmem [shape: f32[50,32], index: 1, kind: input, shape index: {}]   ;;  %s1801_s2 = inlined_call_operand.vmem [shape: bf16[64,256], index: 2, kind: input, shape index: {}]   ;;  %s1802_s3 = inlined_call_operand.hbm [shape: f32[1,256], index: 3, kind: input, shape index: {}]   ;;  %s1803_s4 = inlined_call_operand.hbm [shape: bf16[64,256], index: 4, kind: input, shape index: {}]   ;;  %s1804_s5 = inlined_call_operand.vmem [shape: bf16[64,128], index: 5, kind: input, shape index: {}]   ;;  %s1805_s6 = inlined_call_operand.vmem [shape: f32[1,128], index: 6, kind: input, shape index: {}]   ;;  %s1806_s7 = inlined_call_operand.hbm [shape: f32[2,128], index: 7, kind: output, shape index: {}]  }
   0x1   :  { %13 = vsyncpa [#allocation4], 0 }
   0x2   :  { %14 = vsyncpa [#allocation9], 0 }
   0x3   :  { %15 = vsyncpa [#allocation5], 0  ;;  %s1413_s24 = smov [#allocation3]   ;;  %s1414_s27 = smov [#allocation7]  }
   0x4   :  { %23 = dma.hbm_to_smem %s1799_s0, 32, %s1413_s24, [#allocation6]  }
   0x5   :  { %s34_s28 = sshll.u32 %s1414_s27, 4  ;;  %s1415_s29 = smov [#allocation8]   ;;  %s35_s28 = int_to_ptr.vmem [resolvable:$true] %s34_s28 }
   0x6   :  { %s43_s30 = sshll.u32 %s1415_s29, 4  ;;  %s1353_s8 = scalar_lea.vmem %s35_s28, 32  ;;  %s44_s30 = int_to_ptr.vmem [resolvable:$true] %s43_s30 }
   0x7   :  { %p1354_p0 = scmp.ne.s32.totalorder %s35_s28, %s1353_s8  ;;  %p1358_p1 = scmp.lt.s32.totalorder %s35_s28, %s35_s28 }
   0x8   :  { %p1359_p2 = scmp.lt.s32.totalorder %s1353_s8, %s1353_s8 }
   0xa   :  { %p1360_p3 = por %p1359_p2, %p1358_p1 }
   0xc   :  { %p1361_p4 = pnand %p1360_p3, %p1354_p0 }
   0xe   :  { %1364 = shalt.err (!%p1361_p4)
}
   0xf   :  { %37 = dma.hbm_to_vmem [thread:$0]  %s1802_s3, 32, %s35_s28, [#allocation4]  }
  0x10   :  { %s1373_s11 = scalar_lea.vmem %s44_s30, 1024  ;;  %p1378_p6 = scmp.lt.s32.totalorder %s44_s30, %s44_s30 }
  0x11   :  { %p1374_p5 = scmp.ne.s32.totalorder %s44_s30, %s1373_s11  ;;  %p1379_p7 = scmp.lt.s32.totalorder %s1373_s11, %s1373_s11 }
  0x13   :  { %p1380_p8 = por %p1379_p7, %p1378_p6 }
  0x15   :  { %p1381_p9 = pnand %p1380_p8, %p1374_p5 }
  0x17   :  { %1384 = shalt.err (!%p1381_p9)
}
  0x18   :  { %s1416_s0 = smov 128   ;;  %s1417_s12 = smov 8  }
  0x19   :  { %49 = dma.hbm_to_vmem [thread:$0]  %s1803_s4, 1024, %s44_s30, [#allocation9], %s1416_s0, %s1416_s0, %s1417_s12  }
  0x1a   :  { %1405 = dma.done.wait [#allocation6], 32  }
  0x1b   :  { %1406 = vsyncadd [#allocation6], 4294967264 }
  0x1c   :  { %1407 = dma.done.wait [#allocation4], 32  }
  0x1d   :  { %1408 = vsyncadd [#allocation4], 4294967264 }
  0x1e   :  { %1409 = dma.done.wait [#allocation9], 1024  }
  0x1f   :  { %1410 = vsyncadd [#allocation9], 4294966272 }
  0x20   :  { %63 = sfence }
  0x21   :  { %s1125_s3 = sld [smem:[#allocation3 + $0x1]]  ;;  %vm68_vm0 = vcmask 253952   ;;  %s1418_s27 = smov 32   ;;  %v1513_v6 = vld [vmem:[#allocation8 + $0x34] ss:$8 sps:$4 sm:$0xff]   ;;  %v1419_v28 = vmov 0   ;;  %v224_v56 = vlaneseq }
  0x22   :  { %s65_s15 = sld [smem:[#allocation3]]  ;;  %v1521_v8 = vld [vmem:[#allocation8 + $0x30] ss:$8 sps:$4 sm:$0xff]   ;;  %380 = vmatprep.subr.bf16.mxu1 %v1513_v6  ;;  %v1216_v10 = vld [vmem:[%s1801_s2 + $0x34] ss:$8 sps:$4 sm:$0xff]   ;;  %404 = vmatprep.mubr.bf16.mxu1 %v1419_v28  ;;  %vm74_vm1 = vcmask 516352  }
  0x23   :  { %s1126_s16 = sld [smem:[#allocation3 + $0x81]]  ;;  %381 = vmatpush1.bf16.msra.mxu1 %v1521_v8  ;;  %v1533_v11 = vld [vmem:[#allocation8 + $0x24] ss:$8 sps:$4 sm:$0xff]   ;;  %v1539_v13 = vld [vmem:[#allocation8 + $0x20] ss:$8 sps:$4 sm:$0xff]   ;;  %286 = vmatprep.subr.bf16.mxu0 %v1216_v10  ;;  %vm274_vm2 = vcmask 523264  }
  0x24   :  { %s1124_s17 = sld [smem:[#allocation3 + $0x80]]  ;;  %v1220_v12 = vld [vmem:[%s1801_s2 + $0x30] ss:$8 sps:$4 sm:$0xff]   ;;  %382 = vmatprep.subr.bf16.mxu1 %v1533_v11  ;;  %v1222_v14 = vld [vmem:[%s1801_s2 + $0x24] ss:$8 sps:$4 sm:$0xff]   ;;  %310 = vmatprep.mubr.bf16.mxu0 %v1419_v28  ;;  %v225_v57 = vshrl.u32 %v224_v56, 7 }
  0x25   :  { %s1128_s18 = sld [smem:[#allocation3 + $0x82]]  ;;  %287 = vmatpush1.bf16.msra.mxu0 %v1220_v12  ;;  %v1563_v15 = vld [vmem:[#allocation8 + $0x14] ss:$8 sps:$4 sm:$0xff]   ;;  %v1571_v18 = vld [vmem:[#allocation8 + $0x10] ss:$8 sps:$4 sm:$0xff]   ;;  %vm1422_vm3 = vmmov 0  }
  0x26   :  { %s1127_s19 = sld [smem:[#allocation3 + $0x2]]  ;;  %v1226_v17 = vld [vmem:[%s1801_s2 + $0x20] ss:$8 sps:$4 sm:$0xff]   ;;  %288 = vmatprep.subr.bf16.mxu0 %v1222_v14  ;;  %v1228_v21 = vld [vmem:[%s1801_s2 + $0x14] ss:$8 sps:$4 sm:$0xff]   ;;  %v226_v58 = vsub.s32 0, %v225_v57 }
  0x27   :  { %s86_s22 = scalar_lea.vmem %s1800_s1, %s1125_s3  ;;  %s1476_s23 = sld [smem:[#allocation3 + $0x83]]  ;;  %383 = vmatpush1.bf16.msra.mxu1 %v1539_v13  ;;  %v1592_v22 = vld [vmem:[#allocation8 + $0x4] ss:$8 sps:$4 sm:$0xff]   ;;  %v1599_v24 = vld [vmem:[#allocation8] ss:$8 sps:$4 sm:$0xff]  }
  0x28   :  { %v87_v0 = vld [vmem:[%s86_s22] sm:$0x1]  ;;  %s66_s25 = scalar_lea.vmem %s1800_s1, %s65_s15  ;;  %s1481_s26 = sld [smem:[#allocation3 + $0x3]]  ;;  %384 = vmatprep.subr.bf16.mxu1 %v1563_v15  ;;  %v1232_v23 = vld [vmem:[%s1801_s2 + $0x10] ss:$8 sps:$4 sm:$0xff]  }
  0x29   :  { %90 = vrot.lane.b32.xlu1 %v87_v0, %s1418_s27  ;;  %88 = vst.msk [vmem:[#allocation2 + $0x2] sm:$0x1] %vm68_vm0, %v87_v0  ;;  %v67_v1 = vld [vmem:[%s66_s25] sm:$0x1]  ;;  %s95_s30 = scalar_lea.vmem %s1800_s1, %s1126_s16  ;;  %s1497_s13 = sld [smem:[#allocation3 + $0x84]]  ;;  %289 = vmatpush1.bf16.msra.mxu0 %v1226_v17 }
  0x2a   :  { %71 = vrot.lane.b32.xlu0 %v67_v1, %s1418_s27  ;;  %69 = vst.msk [vmem:[#allocation2] sm:$0x1] %vm68_vm0, %v67_v1  ;;  %v96_v2 = vld [vmem:[%s95_s30] sm:$0x1]  ;;  %s77_s10 = scalar_lea.vmem %s1800_s1, %s1124_s17  ;;  %s1503_s16 = sld [smem:[#allocation3 + $0x4]]  ;;  %290 = vmatprep.subr.bf16.mxu0 %v1228_v21 }
  0x2b   :  { %97 = vst.msk [vmem:[#allocation2 + $0x3] sm:$0x1] %vm68_vm0, %v96_v2  ;;  %v78_v3 = vld [vmem:[%s77_s10] sm:$0x1]  ;;  %s113_s12 = scalar_lea.vmem %s1800_s1, %s1128_s18  ;;  %s1511_s21 = sld [smem:[#allocation3 + $0x85]]  ;;  %385 = vmatpush1.bf16.msra.mxu1 %v1571_v18 }
  0x2c   :  { %79 = vst.msk [vmem:[#allocation2 + $0x1] sm:$0x1] %vm68_vm0, %v78_v3  ;;  %v114_v4 = vld [vmem:[%s113_s12] sm:$0x1]  ;;  %s104_s15 = scalar_lea.vmem %s1800_s1, %s1127_s19  ;;  %s1545_s9 = sld [smem:[#allocation3 + $0x86]]  ;;  %386 = vmatprep.subr.bf16.mxu1 %v1592_v22 }
  0x2d   :  { %99 = vrot.lane.b32.xlu1 %v96_v2, %s1418_s27  ;;  %115 = vst.msk [vmem:[#allocation2 + $0x5] sm:$0x1] %vm68_vm0, %v114_v4  ;;  %v105_v5 = vld [vmem:[%s104_s15] sm:$0x1]  ;;  %s131_s18 = scalar_lea.vmem %s1800_s1, %s1476_s23  ;;  %s1526_s23 = sld [smem:[#allocation3 + $0x5]]  ;;  %291 = vmatpush1.bf16.msra.mxu0 %v1232_v23 }
  0x2e   :  { %81 = vrot.lane.b32.xlu0 %v78_v3, %s1418_s27  ;;  %106 = vst.msk [vmem:[#allocation2 + $0x4] sm:$0x1] %vm68_vm0, %v105_v5  ;;  %v132_v7 = vld [vmem:[%s131_s18] sm:$0x1]  ;;  %s122_s4 = scalar_lea.vmem %s1800_s1, %s1481_s26  ;;  %s1552_s12 = sld [smem:[#allocation3 + $0x6]] }
  0x2f   :  { %133 = vst.msk [vmem:[#allocation2 + $0x7] sm:$0x1] %vm68_vm0, %v132_v7  ;;  %v123_v9 = vld [vmem:[%s122_s4] sm:$0x1]  ;;  %s149_s8 = scalar_lea.vmem %s1800_s1, %s1497_s13  ;;  %s1575_s18 = sld [smem:[#allocation3 + $0x87]]  ;;  %387 = vmatpush1.bf16.msra.mxu1 %v1599_v24 }
  0x30   :  { %124 = vst.msk [vmem:[#allocation2 + $0x6] sm:$0x1] %vm68_vm0, %v123_v9  ;;  %s140_s0 = scalar_lea.vmem %s1800_s1, %s1503_s16  ;;  %v1566_v16 = vld [vmem:[%s149_s8] sm:$0x1]  ;;  %s1584_s4 = sld [smem:[#allocation3 + $0x7]]  ;;  %534 = vmatprep.subr.bf16.mxu1 %v1513_v6 }
  0x31   :  { %117 = vrot.lane.b32.xlu1 %v114_v4, %s1418_s27  ;;  %s167_s13 = scalar_lea.vmem %s1800_s1, %s1511_s21  ;;  %v1573_v19 = vld [vmem:[%s140_s0] sm:$0x1]  ;;  %v1234_v25 = vld [vmem:[%s1801_s2 + $0x4] ss:$8 sps:$4 sm:$0xff]   ;;  %v222_v59 = vld [vmem:[#allocation7] sm:$0x3] }
  0x32   :  { %108 = vrot.lane.b32.xlu0 %v105_v5, %s1418_s27  ;;  %v1578_v20 = vld [vmem:[%s167_s13] sm:$0x1]  ;;  %s185_s10 = scalar_lea.vmem %s1800_s1, %s1545_s9  ;;  %292 = vmatprep.subr.bf16.mxu0 %v1234_v25  ;;  %v227_v60 = vrot.slane %v222_v59, %v226_v58  ;;  %v230_v4 = vsub.s32 1, %v225_v57  ;;  %s1423_s26 = smov [#allocation10]  }
  0x33   :  { %s158_s22 = scalar_lea.vmem %s1800_s1, %s1526_s23  ;;  %v1236_v27 = vld [vmem:[%s1801_s2] ss:$8 sps:$4 sm:$0xff]   ;;  %405 = vmatmul.mubr.bf16.vlgmr.msra.gmra.mxu1 %v1419_v28  ;;  %s1097_s28 = sshll.u32 %s1423_s26, 4  ;;  %s1098_s28 = int_to_ptr.vmem [resolvable:$true] %s1097_s28 }
  0x34   :  { %v159_v26 = vld [vmem:[%s158_s22] sm:$0x1]  ;;  %s176_s14 = scalar_lea.vmem %s1800_s1, %s1552_s12  ;;  %293 = vmatpush1.bf16.msra.mxu0 %v1236_v27  ;;  %535 = vmatpush1.bf16.msra.mxu1 %v1521_v8  ;;  %v1688_v5 = vrot.slane %v222_v59, %v230_v4  ;;  %s1385_s23 = scalar_lea.vmem %s1098_s28, 32 }
  0x35   :  { %135 = vrot.lane.b32.xlu1 %v132_v7, %s1418_s27  ;;  %v186_v29 = vld [vmem:[%s185_s10] sm:$0x1]  ;;  %s203_s15 = scalar_lea.vmem %s1800_s1, %s1575_s18  ;;  %452 = vmatprep.subr.bf16.mxu0 %v1513_v6  ;;  %p1386_p10 = scmp.ne.s32.totalorder %s1098_s28, %s1385_s23 }
  0x36   :  { %126 = vrot.lane.b32.xlu0 %v123_v9, %s1418_s27  ;;  %v177_v30 = vld [vmem:[%s176_s14] sm:$0x1]  ;;  %s194_s16 = scalar_lea.vmem %s1800_s1, %s1584_s4  ;;  %536 = vmatprep.subr.bf16.mxu1 %v1533_v11  ;;  %s1420_s1 = smov 64  }
  0x37   :  { %v204_v31 = vld [vmem:[%s203_s15] sm:$0x1]  ;;  %558 = vmatprep.mubr.bf16.mxu1 %v1419_v28  ;;  %p1390_p11 = scmp.lt.s32.totalorder %s1098_s28, %s1098_s28  ;;  %p1391_p12 = scmp.lt.s32.totalorder %s1385_s23, %s1385_s23 }
  0x38   :  { %v195_v32 = vld [vmem:[%s194_s16] sm:$0x1]  ;;  %537 = vmatpush1.bf16.msra.mxu1 %v1539_v13 }
  0x39   :  { %153 = vrot.lane.b32.xlu1 %v1566_v16, %s1418_s27  ;;  %538 = vmatprep.subr.bf16.mxu1 %v1563_v15  ;;  %p1392_p13 = por %p1391_p12, %p1390_p11 }
  0x3a   :  { %144 = vrot.lane.b32.xlu0 %v1573_v19, %s1418_s27 }
  0x3b   :  { %p1393_p0 = pnand %p1392_p13, %p1386_p10 }
  0x3c   :  { %539 = vmatpush1.bf16.msra.mxu1 %v1571_v18 }
  0x3d   :  { %171 = vrot.lane.b32.xlu1 %v1578_v20, %s1418_s27  ;;  %540 = vmatprep.subr.bf16.mxu1 %v1592_v22 }
  0x3e   :  { %162 = vrot.lane.b32.xlu0 %v159_v26, %s1418_s27 }
  0x40   :  { %541 = vmatpush1.bf16.msra.mxu1 %v1599_v24 }
  0x41   :  { %189 = vrot.lane.b32.xlu1 %v186_v29, %s1418_s27  ;;  %698 = vmatprep.subr.bf16.mxu1 %v1513_v6 }
  0x42   :  { %180 = vrot.lane.b32.xlu0 %v177_v30, %s1418_s27 }
  0x45   :  { %207 = vrot.lane.b32.xlu1 %v204_v31, %s1418_s27 }
  0x46   :  { %198 = vrot.lane.b32.xlu0 %v195_v32, %s1418_s27 }
  0x9b   :  { %v91_v33 = vpop.permute.xlu1 %90 }
  0x9c   :  { %93 = vst.msk [vmem:[#allocation2 + $0xc] sm:$0x1] %vm74_vm1, %v91_v33  ;;  %v72_v34 = vpop.permute.xlu0 %71 }
  0x9d   :  { %178 = vst.msk [vmem:[#allocation2 + $0xc] sm:$0x1] %vm68_vm0, %v177_v30 }
  0x9e   :  { %75 = vst.msk [vmem:[#allocation2 + $0xe] sm:$0x1] %vm74_vm1, %v72_v34 }
  0x9f   :  { %196 = vst.msk [vmem:[#allocation2 + $0xe] sm:$0x1] %vm68_vm0, %v195_v32  ;;  %v100_v35 = vpop.permute.xlu1 %99 }
  0xa0   :  { %102 = vst.msk [vmem:[#allocation2 + $0xd] sm:$0x1] %vm74_vm1, %v100_v35  ;;  %v82_v36 = vpop.permute.xlu0 %81 }
  0xa1   :  { %187 = vst.msk [vmem:[#allocation2 + $0xd] sm:$0x1] %vm68_vm0, %v186_v29 }
  0xa2   :  { %84 = vst.msk [vmem:[#allocation2 + $0xf] sm:$0x1] %vm74_vm1, %v82_v36 }
  0xa3   :  { %205 = vst.msk [vmem:[#allocation2 + $0xf] sm:$0x1] %vm68_vm0, %v204_v31  ;;  %v118_v37 = vpop.permute.xlu1 %117 }
  0xa4   :  { %120 = vst.msk [vmem:[#allocation2 + $0xb] sm:$0x1] %vm74_vm1, %v118_v37  ;;  %v109_v38 = vpop.permute.xlu0 %108 }
  0xa5   :  { %169 = vst.msk [vmem:[#allocation2 + $0xb] sm:$0x1] %vm68_vm0, %v1578_v20 }
  0xa6   :  { %111 = vst.msk [vmem:[#allocation2 + $0xa] sm:$0x1] %vm74_vm1, %v109_v38 }
  0xa7   :  { %160 = vst.msk [vmem:[#allocation2 + $0xa] sm:$0x1] %vm68_vm0, %v159_v26  ;;  %v136_v39 = vpop.permute.xlu1 %135 }
  0xa8   :  { %138 = vst.msk [vmem:[#allocation2 + $0x9] sm:$0x1] %vm74_vm1, %v136_v39  ;;  %v127_v40 = vpop.permute.xlu0 %126 }
  0xa9   :  { %151 = vst.msk [vmem:[#allocation2 + $0x9] sm:$0x1] %vm68_vm0, %v1566_v16 }
  0xaa   :  { %129 = vst.msk [vmem:[#allocation2 + $0x8] sm:$0x1] %vm74_vm1, %v127_v40 }
  0xab   :  { %142 = vst.msk [vmem:[#allocation2 + $0x8] sm:$0x1] %vm68_vm0, %v1573_v19  ;;  %v154_v41 = vpop.permute.xlu1 %153 }
  0xac   :  { %156 = vst.msk [vmem:[#allocation2 + $0x7] sm:$0x1] %vm74_vm1, %v154_v41  ;;  %v145_v42 = vpop.permute.xlu0 %144 }
  0xad   :  { %147 = vst.msk [vmem:[#allocation2 + $0x6] sm:$0x1] %vm74_vm1, %v145_v42 }
  0xaf   :  { %v172_v43 = vpop.permute.xlu1 %171 }
  0xb0   :  { %174 = vst.msk [vmem:[#allocation2 + $0x5] sm:$0x1] %vm74_vm1, %v172_v43  ;;  %v163_v44 = vpop.permute.xlu0 %162 }
  0xb1   :  { %165 = vst.msk [vmem:[#allocation2 + $0x4] sm:$0x1] %vm74_vm1, %v163_v44 }
  0xb2   :  { %v212_v49 = vld [vmem:[#allocation2 + $0x8] sm:$0xff] }
  0xb3   :  { %v190_v45 = vpop.permute.xlu1 %189 }
  0xb4   :  { %192 = vst.msk [vmem:[#allocation2 + $0x3] sm:$0x1] %vm74_vm1, %v190_v45  ;;  %v181_v46 = vpop.permute.xlu0 %180 }
  0xb5   :  { %183 = vst.msk [vmem:[#allocation2 + $0x2] sm:$0x1] %vm74_vm1, %v181_v46 }
  0xb7   :  { %v208_v47 = vpop.permute.xlu1 %207 }
  0xb8   :  { %210 = vst.msk [vmem:[#allocation2 + $0x1] sm:$0x1] %vm74_vm1, %v208_v47  ;;  %v199_v48 = vpop.permute.xlu0 %198 }
  0xb9   :  { %201 = vst.msk [vmem:[#allocation2] sm:$0x1] %vm74_vm1, %v199_v48 }
  0xc0   :  { %v211_v50 = vld [vmem:[#allocation2] sm:$0xff] }
  0xc1   :  { %v213_v51 = vpack.c.bf16 %v212_v49, %v211_v50 }
  0xc3   :  { %1147 = vmatmul.mubr.msk.bf16.vlgmr.msra.gmra.mxu0 %vm274_vm2, %v213_v51 }
  0xc4   :  { %453 = vmatpush1.bf16.msra.mxu0 %v1521_v8  ;;  %476 = vmatprep.mubr.bf16.mxu0 %v1419_v28 }
  0xc5   :  { %454 = vmatprep.subr.bf16.mxu0 %v1533_v11 }
  0xc8   :  { %455 = vmatpush1.bf16.msra.mxu0 %v1539_v13 }
  0xc9   :  { %456 = vmatprep.subr.bf16.mxu0 %v1563_v15 }
  0xcc   :  { %457 = vmatpush1.bf16.msra.mxu0 %v1571_v18 }
  0xcd   :  { %458 = vmatprep.subr.bf16.mxu0 %v1592_v22 }
  0xd0   :  { %459 = vmatpush1.bf16.msra.mxu0 %v1599_v24 }
  0xd1   :  { %616 = vmatprep.subr.bf16.mxu0 %v1513_v6 }
  0xf3   :  { %v406_v52 = vpop.f32.mrf.mxu1 }
  0xf5   :  { %v408_v53 = vpop.f32.mrf.mxu1 }
  0xf7   :  { %v410_v54 = vpop.f32.mrf.mxu1 }
  0xf9   :  { %v411_v55 = vpop.f32.mrf.mxu1 }
 0x183   :  { %v312_v61 = vpop.f32.mrf.mxu0 }
 0x184   :  { %v1683_v62 = vadd.f32 %v312_v61, %v227_v60 }
 0x185   :  { %v314_v63 = vpop.f32.mrf.mxu0 }
 0x186   :  { %v413_v0 = vadd.f32 %v406_v52, %v1683_v62  ;;  %v1691_v7 = vadd.f32 %v314_v63, %v1688_v5 }
 0x187   :  { %v316_v1 = vpop.f32.mrf.mxu0 }
 0x188   :  { %v1156_v2 = vmul.f32 -1.442695, %v413_v0  ;;  %v1686_v3 = vadd.f32 %v316_v1, %v227_v60  ;;  %v414_v9 = vadd.f32 %v408_v53, %v1691_v7 }
 0x189   :  { %v1706_v33 = vpop.f32.mrf.mxu0 }
 0x18a   :  { %1241 = vpow2.f32 %v1156_v2  ;;  %v1157_v19 = vmul.f32 -1.442695, %v414_v9 }
 0x18b   :  { %1243 = vtanh.f32 %v414_v9 }
 0x197   :  { %v1242_v10 = vpop.eup %1241 }
 0x198   :  { %v418_v12 = vadd.f32 1.0, %v1242_v10  ;;  %v1244_v14 = vpop.eup %1243 }
 0x19a   :  { %1245 = vrcp.f32 %v418_v12 }
 0x19b   :  { %1247 = vpow2.f32 %v1157_v19 }
 0x1a7   :  { %v1246_v16 = vpop.eup %1245 }
 0x1a8   :  { %v429_v17 = vmul.f32 %v1246_v16, %v1244_v14  ;;  %v1248_v20 = vpop.eup %1247  ;;  %v428_v23 = vmul.f32 0.0, %v1246_v16 }
 0x1a9   :  { %v425_v21 = vadd.f32 1.0, %v1248_v20 }
 0x1aa   :  { %431 = vrot.lane.b32.xlu0 %v429_v17, %s1420_s1 }
 0x1ab   :  { %1249 = vrcp.f32 %v425_v21 }
 0x1b8   :  { %v1250_v27 = vpop.eup %1249 }
 0x21c   :  { %v432_v25 = vpop.permute.xlu0 %431 }
 0x21d   :  { %v434_v26 = vadd.f32 %v432_v25, %v428_v23 }
 0x21f   :  { %1251 = vtanh.f32 %v434_v26  ;;  %v507_v46 = vrot.slane %v434_v26, 6 }
 0x22c   :  { %v1252_v29 = vpop.eup %1251 }
 0x22d   :  { %v436_v30 = vmul.f32 %v1252_v29, %v1250_v27 }
 0x22f   :  { %v437_v31 = vpack.c.bf16 %v436_v30, %v436_v30 }
 0x231   :  { %439 = vrot.lane.b32.xlu1 %v437_v31, %s1420_s1 }
 0x2a3   :  { %v440_v32 = vpop.permute.xlu1 %439 }
 0x2a4   :  { %1158 = vmatmul.mubr.msk.bf16.vlgmr.msra.gmra.mxu0 %vm274_vm2, %v440_v32 }
 0x2a5   :  { %617 = vmatpush1.bf16.msra.mxu0 %v1521_v8  ;;  %640 = vmatprep.mubr.bf16.mxu0 %v1419_v28 }
 0x2a6   :  { %618 = vmatprep.subr.bf16.mxu0 %v1533_v11 }
 0x2a9   :  { %619 = vmatpush1.bf16.msra.mxu0 %v1539_v13 }
 0x2aa   :  { %620 = vmatprep.subr.bf16.mxu0 %v1563_v15 }
 0x2ad   :  { %621 = vmatpush1.bf16.msra.mxu0 %v1571_v18 }
 0x2ae   :  { %622 = vmatprep.subr.bf16.mxu0 %v1592_v22 }
 0x2b1   :  { %623 = vmatpush1.bf16.msra.mxu0 %v1599_v24 }
 0x2b2   :  { %773 = vmatprep.subr.bf16.mxu0 %v1513_v6 }
 0x364   :  { %v478_v34 = vpop.f32.mrf.mxu0 }
 0x365   :  { %v487_v35 = vrot.slane %v478_v34, 6 }
 0x366   :  { %v480_v36 = vpop.f32.mrf.mxu0 }
 0x367   :  { %v491_v37 = vadd.f32 %v487_v35, %v1683_v62  ;;  %v488_v41 = vrot.slane %v480_v36, 6 }
 0x368   :  { %v482_v38 = vpop.f32.mrf.mxu0 }
 0x369   :  { %v1159_v39 = vmul.f32 -1.442695, %v491_v37  ;;  %v492_v42 = vadd.f32 %v488_v41, %v1691_v7 }
 0x36a   :  { %v483_v40 = vpop.f32.mrf.mxu0 }
 0x36b   :  { %1253 = vpow2.f32 %v1159_v39  ;;  %v1160_v50 = vmul.f32 -1.442695, %v492_v42 }
 0x36c   :  { %1255 = vtanh.f32 %v492_v42 }
 0x378   :  { %v1254_v43 = vpop.eup %1253 }
 0x379   :  { %v496_v44 = vadd.f32 1.0, %v1254_v43  ;;  %v1256_v45 = vpop.eup %1255 }
 0x37b   :  { %1257 = vrcp.f32 %v496_v44 }
 0x37c   :  { %1259 = vpow2.f32 %v1160_v50 }
 0x388   :  { %v1258_v47 = vpop.eup %1257 }
 0x389   :  { %v510_v48 = vmul.f32 %v1258_v47, %v1256_v45  ;;  %v509_v49 = vmul.f32 %v1258_v47, %v507_v46  ;;  %v1260_v51 = vpop.eup %1259 }
 0x38a   :  { %v503_v52 = vadd.f32 1.0, %v1260_v51 }
 0x38b   :  { %512 = vrot.lane.b32.xlu0 %v510_v48, %s1420_s1 }
 0x38c   :  { %1261 = vrcp.f32 %v503_v52 }
 0x399   :  { %v1262_v55 = vpop.eup %1261 }
 0x3fd   :  { %v513_v53 = vpop.permute.xlu0 %512 }
 0x3fe   :  { %v515_v54 = vadd.f32 %v513_v53, %v509_v49 }
 0x400   :  { %1263 = vtanh.f32 %v515_v54  ;;  %v589_v19 = vrot.slane %v515_v54, 6 }
 0x40d   :  { %v1264_v56 = vpop.eup %1263 }
 0x40e   :  { %v517_v57 = vmul.f32 %v1264_v56, %v1262_v55 }
 0x410   :  { %v518_v58 = vpack.c.bf16 %v517_v57, %v517_v57 }
 0x412   :  { %v520_v59 = vrot.slane %v518_v58, 1 }
 0x414   :  { %521 = vrot.lane.b32.xlu1 %v520_v59, %s1420_s1 }
 0x486   :  { %v522_v60 = vpop.permute.xlu1 %521 }
 0x487   :  { %1161 = vmatmul.mubr.msk.bf16.vlgmr.msra.gmra.mxu1 %vm274_vm2, %v522_v60 }
 0x488   :  { %699 = vmatpush1.bf16.msra.mxu1 %v1521_v8  ;;  %722 = vmatprep.mubr.bf16.mxu1 %v1419_v28 }
 0x489   :  { %700 = vmatprep.subr.bf16.mxu1 %v1533_v11 }
 0x48c   :  { %701 = vmatpush1.bf16.msra.mxu1 %v1539_v13 }
 0x48d   :  { %702 = vmatprep.subr.bf16.mxu1 %v1563_v15 }
 0x490   :  { %703 = vmatpush1.bf16.msra.mxu1 %v1571_v18 }
 0x491   :  { %704 = vmatprep.subr.bf16.mxu1 %v1592_v22 }
 0x494   :  { %705 = vmatpush1.bf16.msra.mxu1 %v1599_v24 }
 0x495   :  { %855 = vmatprep.subr.bf16.mxu1 %v1513_v6 }
 0x547   :  { %v560_v61 = vpop.f32.mrf.mxu1 }
 0x548   :  { %v569_v63 = vrot.slane %v560_v61, 4 }
 0x549   :  { %v562_v0 = vpop.f32.mrf.mxu1 }
 0x54a   :  { %v573_v1 = vadd.f32 %v569_v63, %v1683_v62  ;;  %v570_v10 = vrot.slane %v562_v0, 4 }
 0x54b   :  { %v564_v2 = vpop.f32.mrf.mxu1 }
 0x54c   :  { %v1162_v4 = vmul.f32 -1.442695, %v573_v1  ;;  %v574_v12 = vadd.f32 %v570_v10, %v1691_v7  ;;  %v1752_v10 = vadd.f32 %v1706_v33, %v1688_v5 }
 0x54d   :  { %v565_v9 = vpop.f32.mrf.mxu1 }
 0x54e   :  { %1265 = vpow2.f32 %v1162_v4  ;;  %v1163_v25 = vmul.f32 -1.442695, %v574_v12 }
 0x54f   :  { %1267 = vtanh.f32 %v574_v12 }
 0x55b   :  { %v1266_v14 = vpop.eup %1265 }
 0x55c   :  { %v578_v16 = vadd.f32 1.0, %v1266_v14  ;;  %v1268_v17 = vpop.eup %1267 }
 0x55e   :  { %1269 = vrcp.f32 %v578_v16 }
 0x55f   :  { %1271 = vpow2.f32 %v1163_v25 }
 0x56b   :  { %v1270_v20 = vpop.eup %1269 }
 0x56c   :  { %v592_v21 = vmul.f32 %v1270_v20, %v1268_v17  ;;  %v591_v23 = vmul.f32 %v1270_v20, %v589_v19  ;;  %v1272_v26 = vpop.eup %1271 }
 0x56d   :  { %v585_v27 = vadd.f32 1.0, %v1272_v26 }
 0x56e   :  { %594 = vrot.lane.b32.xlu0 %v592_v21, %s1420_s1 }
 0x56f   :  { %1273 = vrcp.f32 %v585_v27 }
 0x57c   :  { %v1274_v31 = vpop.eup %1273 }
 0x5e0   :  { %v595_v29 = vpop.permute.xlu0 %594 }
 0x5e1   :  { %v597_v30 = vadd.f32 %v595_v29, %v591_v23 }
 0x5e3   :  { %1275 = vtanh.f32 %v597_v30  ;;  %v671_v50 = vrot.slane %v597_v30, 6 }
 0x5f0   :  { %v1276_v32 = vpop.eup %1275 }
 0x5f1   :  { %v599_v34 = vmul.f32 %v1276_v32, %v1274_v31 }
 0x5f3   :  { %v600_v35 = vpack.c.bf16 %v599_v34, %v599_v34 }
 0x5f5   :  { %v602_v36 = vrot.slane %v600_v35, 2 }
 0x5f7   :  { %603 = vrot.lane.b32.xlu1 %v602_v36, %s1420_s1 }
 0x669   :  { %v604_v37 = vpop.permute.xlu1 %603 }
 0x66a   :  { %1164 = vmatmul.mubr.msk.bf16.vlgmr.msra.gmra.mxu0 %vm274_vm2, %v604_v37 }
 0x66b   :  { %774 = vmatpush1.bf16.msra.mxu0 %v1521_v8  ;;  %797 = vmatprep.mubr.bf16.mxu0 %v1419_v28 }
 0x66c   :  { %775 = vmatprep.subr.bf16.mxu0 %v1533_v11 }
 0x66f   :  { %776 = vmatpush1.bf16.msra.mxu0 %v1539_v13 }
 0x670   :  { %777 = vmatprep.subr.bf16.mxu0 %v1563_v15 }
 0x673   :  { %778 = vmatpush1.bf16.msra.mxu0 %v1571_v18 }
 0x674   :  { %779 = vmatprep.subr.bf16.mxu0 %v1592_v22 }
 0x677   :  { %780 = vmatpush1.bf16.msra.mxu0 %v1599_v24 }
 0x678   :  { %937 = vmatprep.subr.bf16.mxu0 %v1513_v6 }
 0x72a   :  { %v642_v38 = vpop.f32.mrf.mxu0 }
 0x72b   :  { %v651_v39 = vrot.slane %v642_v38, 2 }
 0x72c   :  { %v644_v40 = vpop.f32.mrf.mxu0 }
 0x72d   :  { %v655_v41 = vadd.f32 %v651_v39, %v1683_v62  ;;  %v652_v45 = vrot.slane %v644_v40, 2 }
 0x72e   :  { %v646_v42 = vpop.f32.mrf.mxu0 }
 0x72f   :  { %v1165_v43 = vmul.f32 -1.442695, %v655_v41  ;;  %v656_v46 = vadd.f32 %v652_v45, %v1691_v7 }
 0x730   :  { %v647_v44 = vpop.f32.mrf.mxu0 }
 0x731   :  { %1277 = vpow2.f32 %v1165_v43  ;;  %v1166_v53 = vmul.f32 -1.442695, %v656_v46 }
 0x732   :  { %1279 = vtanh.f32 %v656_v46 }
 0x73e   :  { %v1278_v47 = vpop.eup %1277 }
 0x73f   :  { %v660_v48 = vadd.f32 1.0, %v1278_v47  ;;  %v1280_v49 = vpop.eup %1279 }
 0x741   :  { %1281 = vrcp.f32 %v660_v48 }
 0x742   :  { %1283 = vpow2.f32 %v1166_v53 }
 0x74e   :  { %v1282_v51 = vpop.eup %1281 }
 0x74f   :  { %v674_v6 = vmul.f32 %v1282_v51, %v1280_v49  ;;  %v673_v52 = vmul.f32 %v1282_v51, %v671_v50  ;;  %v1284_v62 = vpop.eup %1283 }
 0x750   :  { %v667_v54 = vadd.f32 1.0, %v1284_v62 }
 0x751   :  { %676 = vrot.lane.b32.xlu0 %v674_v6, %s1420_s1 }
 0x752   :  { %1285 = vrcp.f32 %v667_v54 }
 0x75f   :  { %v1286_v7 = vpop.eup %1285 }
 0x7c3   :  { %v677_v55 = vpop.permute.xlu0 %676 }
 0x7c4   :  { %v679_v56 = vadd.f32 %v677_v55, %v673_v52 }
 0x7c6   :  { %1287 = vtanh.f32 %v679_v56  ;;  %v747_v19 = vrot.slane %v679_v56, 6 }
 0x7d3   :  { %v1288_v57 = vpop.eup %1287 }
 0x7d4   :  { %v681_v58 = vmul.f32 %v1288_v57, %v1286_v7 }
 0x7d6   :  { %v682_v59 = vpack.c.bf16 %v681_v58, %v681_v58 }
 0x7d8   :  { %v684_v60 = vrot.slane %v682_v59, 3 }
 0x7da   :  { %685 = vrot.lane.b32.xlu1 %v684_v60, %s1420_s1 }
 0x84c   :  { %v686_v61 = vpop.permute.xlu1 %685 }
 0x84d   :  { %1167 = vmatmul.mubr.msk.bf16.vlgmr.msra.gmra.mxu1 %vm274_vm2, %v686_v61 }
 0x84e   :  { %856 = vmatpush1.bf16.msra.mxu1 %v1521_v8  ;;  %879 = vmatprep.mubr.bf16.mxu1 %v1419_v28 }
 0x84f   :  { %857 = vmatprep.subr.bf16.mxu1 %v1533_v11 }
 0x852   :  { %858 = vmatpush1.bf16.msra.mxu1 %v1539_v13 }
 0x853   :  { %859 = vmatprep.subr.bf16.mxu1 %v1563_v15 }
 0x856   :  { %860 = vmatpush1.bf16.msra.mxu1 %v1571_v18 }
 0x857   :  { %861 = vmatprep.subr.bf16.mxu1 %v1592_v22 }
 0x85a   :  { %862 = vmatpush1.bf16.msra.mxu1 %v1599_v24 }
 0x90d   :  { %v724_v63 = vpop.f32.mrf.mxu1 }
 0x90e   :  { %v731_v0 = vadd.f32 %v724_v63, %v1686_v3 }
 0x90f   :  { %v726_v1 = vpop.f32.mrf.mxu1 }
 0x910   :  { %v1168_v2 = vmul.f32 -1.442695, %v731_v0  ;;  %v732_v12 = vadd.f32 %v726_v1, %v1752_v10 }
 0x911   :  { %v728_v4 = vpop.f32.mrf.mxu1 }
 0x912   :  { %1289 = vpow2.f32 %v1168_v2  ;;  %v1169_v25 = vmul.f32 -1.442695, %v732_v12 }
 0x913   :  { %v729_v9 = vpop.f32.mrf.mxu1  ;;  %1291 = vtanh.f32 %v732_v12 }
 0x91f   :  { %v1290_v14 = vpop.eup %1289 }
 0x920   :  { %v736_v16 = vadd.f32 1.0, %v1290_v14  ;;  %v1292_v17 = vpop.eup %1291 }
 0x922   :  { %1293 = vrcp.f32 %v736_v16 }
 0x923   :  { %1295 = vpow2.f32 %v1169_v25 }
 0x92f   :  { %v1294_v20 = vpop.eup %1293 }
 0x930   :  { %v750_v21 = vmul.f32 %v1294_v20, %v1292_v17  ;;  %v749_v23 = vmul.f32 %v1294_v20, %v747_v19  ;;  %v1296_v26 = vpop.eup %1295 }
 0x931   :  { %v743_v27 = vadd.f32 1.0, %v1296_v26 }
 0x932   :  { %752 = vrot.lane.b32.xlu0 %v750_v21, %s1420_s1 }
 0x933   :  { %1297 = vrcp.f32 %v743_v27 }
 0x940   :  { %v1298_v33 = vpop.eup %1297 }
 0x9a4   :  { %v753_v29 = vpop.permute.xlu0 %752 }
 0x9a5   :  { %v755_v5 = vadd.f32 %v753_v29, %v749_v23 }
 0x9a7   :  { %1299 = vtanh.f32 %v755_v5 }
 0x9b4   :  { %v1300_v30 = vpop.eup %1299 }
 0x9b5   :  { %v757_v31 = vmul.f32 %v1300_v30, %v1298_v33 }
 0x9b7   :  { %v758_v32 = vpack.c.bf16 %v757_v31, %v757_v31 }
 0x9b9   :  { %760 = vrot.lane.b32.xlu1 %v758_v32, %s1420_s1 }
 0xa2b   :  { %v761_v34 = vpop.permute.xlu1 %760 }
 0xa2c   :  { %1170 = vmatmul.mubr.msk.bf16.vlgmr.msra.gmra.mxu0 %vm274_vm2, %v761_v34 }
 0xa2d   :  { %938 = vmatpush1.bf16.msra.mxu0 %v1521_v8  ;;  %961 = vmatprep.mubr.bf16.mxu0 %v1419_v28 }
 0xa2e   :  { %939 = vmatprep.subr.bf16.mxu0 %v1533_v11 }
 0xa31   :  { %940 = vmatpush1.bf16.msra.mxu0 %v1539_v13 }
 0xa32   :  { %941 = vmatprep.subr.bf16.mxu0 %v1563_v15 }
 0xa35   :  { %942 = vmatpush1.bf16.msra.mxu0 %v1571_v18 }
 0xa36   :  { %943 = vmatprep.subr.bf16.mxu0 %v1592_v22  ;;  %v828_v22 = vrot.slane %v755_v5, 6 }
 0xa39   :  { %944 = vmatpush1.bf16.msra.mxu0 %v1599_v24 }
 0xaec   :  { %v799_v35 = vpop.f32.mrf.mxu0 }
 0xaed   :  { %v808_v36 = vrot.slane %v799_v35, 6 }
 0xaee   :  { %v801_v37 = vpop.f32.mrf.mxu0 }
 0xaef   :  { %v812_v38 = vadd.f32 %v808_v36, %v1686_v3  ;;  %v809_v11 = vrot.slane %v801_v37, 6 }
 0xaf0   :  { %v803_v8 = vpop.f32.mrf.mxu0 }
 0xaf1   :  { %v1171_v39 = vmul.f32 -1.442695, %v812_v38  ;;  %v813_v13 = vadd.f32 %v809_v11, %v1752_v10 }
 0xaf2   :  { %v804_v28 = vpop.f32.mrf.mxu0 }
 0xaf3   :  { %1301 = vpow2.f32 %v1171_v39  ;;  %v1172_v43 = vmul.f32 -1.442695, %v813_v13 }
 0xaf4   :  { %1303 = vtanh.f32 %v813_v13  ;;  %v1421_v13 = vmov 0.0  }
 0xaf5   :  { %1190 = vmatprep.subr.bf16.mxu1 %v1421_v13 }
 0xb00   :  { %v1302_v40 = vpop.eup %1301 }
 0xb01   :  { %v817_v15 = vadd.f32 1.0, %v1302_v40  ;;  %v1304_v18 = vpop.eup %1303  ;;  %v1239_v40 = vld [vmem:[%s1804_s5 + $0x8] sm:$0xff]  }
 0xb03   :  { %1305 = vrcp.f32 %v817_v15  ;;  %v1240_v15 = vld [vmem:[%s1804_s5] sm:$0xff]  }
 0xb04   :  { %1307 = vpow2.f32 %v1172_v43 }
 0xb10   :  { %v1306_v41 = vpop.eup %1305 }
 0xb11   :  { %v831_v24 = vmul.f32 %v1306_v41, %v1304_v18  ;;  %v830_v42 = vmul.f32 %v1306_v41, %v828_v22  ;;  %v1308_v44 = vpop.eup %1307 }
 0xb12   :  { %v824_v45 = vadd.f32 1.0, %v1308_v44 }
 0xb13   :  { %833 = vrot.lane.b32.xlu0 %v831_v24, %s1420_s1 }
 0xb14   :  { %1309 = vrcp.f32 %v824_v45 }
 0xb21   :  { %v1310_v48 = vpop.eup %1309 }
 0xb85   :  { %v834_v46 = vpop.permute.xlu0 %833 }
 0xb86   :  { %v836_v47 = vadd.f32 %v834_v46, %v830_v42 }
 0xb88   :  { %1311 = vtanh.f32 %v836_v47  ;;  %v910_v0 = vrot.slane %v836_v47, 6 }
 0xb95   :  { %v1312_v49 = vpop.eup %1311 }
 0xb96   :  { %v838_v50 = vmul.f32 %v1312_v49, %v1310_v48  ;;  %v1179_v49 = vld [vmem:[%s1805_s6] ss:$0 sm:$0xff] }
 0xb98   :  { %v839_v51 = vpack.c.bf16 %v838_v50, %v838_v50 }
 0xb9a   :  { %v841_v6 = vrot.slane %v839_v51, 1 }
 0xb9c   :  { %842 = vrot.lane.b32.xlu1 %v841_v6, %s1420_s1 }
 0xc0e   :  { %v843_v52 = vpop.permute.xlu1 %842 }
 0xc0f   :  { %1173 = vmatmul.mubr.msk.bf16.vlgmr.msra.gmra.mxu1 %vm274_vm2, %v843_v52 }
 0xc10   :  { %1198 = vmatprep.mubr.msk.bf16.mxu1 %vm1422_vm3, %v1421_v13 }
 0xccf   :  { %v881_v53 = vpop.f32.mrf.mxu1 }
 0xcd0   :  { %v890_v62 = vrot.slane %v881_v53, 4 }
 0xcd1   :  { %v883_v54 = vpop.f32.mrf.mxu1 }
 0xcd2   :  { %v894_v55 = vadd.f32 %v890_v62, %v1686_v3  ;;  %v891_v58 = vrot.slane %v883_v54, 4 }
 0xcd3   :  { %v885_v56 = vpop.f32.mrf.mxu1 }
 0xcd4   :  { %v1174_v7 = vmul.f32 -1.442695, %v894_v55  ;;  %v895_v59 = vadd.f32 %v891_v58, %v1752_v10 }
 0xcd5   :  { %v886_v57 = vpop.f32.mrf.mxu1 }
 0xcd6   :  { %1313 = vpow2.f32 %v1174_v7  ;;  %v1175_v9 = vmul.f32 -1.442695, %v895_v59 }
 0xcd7   :  { %1315 = vtanh.f32 %v895_v59 }
 0xce3   :  { %v1314_v60 = vpop.eup %1313 }
 0xce4   :  { %v899_v61 = vadd.f32 1.0, %v1314_v60  ;;  %v1316_v63 = vpop.eup %1315 }
 0xce6   :  { %1317 = vrcp.f32 %v899_v61 }
 0xce7   :  { %1319 = vpow2.f32 %v1175_v9 }
 0xcf3   :  { %v1318_v1 = vpop.eup %1317 }
 0xcf4   :  { %v913_v2 = vmul.f32 %v1318_v1, %v1316_v63  ;;  %v912_v4 = vmul.f32 %v1318_v1, %v910_v0  ;;  %v1320_v12 = vpop.eup %1319 }
 0xcf5   :  { %v906_v14 = vadd.f32 1.0, %v1320_v12 }
 0xcf6   :  { %915 = vrot.lane.b32.xlu0 %v913_v2, %s1420_s1 }
 0xcf7   :  { %1321 = vrcp.f32 %v906_v14 }
 0xd04   :  { %v1322_v19 = vpop.eup %1321 }
 0xd68   :  { %v916_v16 = vpop.permute.xlu0 %915 }
 0xd69   :  { %v918_v17 = vadd.f32 %v916_v16, %v912_v4 }
 0xd6b   :  { %1323 = vtanh.f32 %v918_v17  ;;  %v992_v8 = vrot.slane %v918_v17, 6 }
 0xd78   :  { %v1324_v20 = vpop.eup %1323 }
 0xd79   :  { %v920_v21 = vmul.f32 %v1324_v20, %v1322_v19 }
 0xd7b   :  { %v921_v23 = vpack.c.bf16 %v920_v21, %v920_v21 }
 0xd7d   :  { %v923_v25 = vrot.slane %v921_v23, 2 }
 0xd7f   :  { %924 = vrot.lane.b32.xlu1 %v923_v25, %s1420_s1 }
 0xdf1   :  { %v925_v26 = vpop.permute.xlu1 %924 }
 0xdf2   :  { %1176 = vmatmul.mubr.msk.bf16.vlgmr.msra.gmra.mxu0 %vm274_vm2, %v925_v26 }
 0xeb2   :  { %v963_v27 = vpop.f32.mrf.mxu0 }
 0xeb3   :  { %v972_v29 = vrot.slane %v963_v27, 2 }
 0xeb4   :  { %v965_v5 = vpop.f32.mrf.mxu0 }
 0xeb5   :  { %v976_v33 = vadd.f32 %v972_v29, %v1686_v3  ;;  %v973_v34 = vrot.slane %v965_v5, 2  ;;  %v1237_v3 = vld [vmem:[%s1804_s5 + $0x18] sm:$0xff]  }
 0xeb6   :  { %v967_v30 = vpop.f32.mrf.mxu0  ;;  %1191 = vmatpush3.bf16.msra.mxu1 %v1237_v3 }
 0xeb7   :  { %v1177_v31 = vmul.f32 -1.442695, %v976_v33  ;;  %v977_v35 = vadd.f32 %v973_v34, %v1752_v10  ;;  %v1238_v10 = vld [vmem:[%s1804_s5 + $0x10] sm:$0xff]   ;;  %1192 = vmatprep.subr.bf16.mxu1 %v1421_v13 }
 0xeb8   :  { %v968_v32 = vpop.f32.mrf.mxu0 }
 0xeb9   :  { %1325 = vpow2.f32 %v1177_v31  ;;  %v1178_v18 = vmul.f32 -1.442695, %v977_v35 }
 0xeba   :  { %1327 = vtanh.f32 %v977_v35  ;;  %1193 = vmatpush3.bf16.msra.mxu1 %v1238_v10 }
 0xebb   :  { %1194 = vmatprep.subr.bf16.mxu1 %v1421_v13 }
 0xebe   :  { %1195 = vmatpush3.bf16.msra.mxu1 %v1239_v40 }
 0xebf   :  { %1196 = vmatprep.subr.bf16.mxu1 %v1421_v13 }
 0xec2   :  { %1197 = vmatpush3.bf16.msra.mxu1 %v1240_v15 }
 0xec6   :  { %v1326_v36 = vpop.eup %1325 }
 0xec7   :  { %v981_v37 = vadd.f32 1.0, %v1326_v36  ;;  %v1328_v38 = vpop.eup %1327 }
 0xec9   :  { %1329 = vrcp.f32 %v981_v37 }
 0xeca   :  { %1331 = vpow2.f32 %v1178_v18 }
 0xed6   :  { %v1330_v39 = vpop.eup %1329 }
 0xed7   :  { %v995_v28 = vmul.f32 %v1330_v39, %v1328_v38  ;;  %v994_v11 = vmul.f32 %v1330_v39, %v992_v8  ;;  %v1332_v22 = vpop.eup %1331 }
 0xed8   :  { %v988_v41 = vadd.f32 1.0, %v1332_v22 }
 0xed9   :  { %997 = vrot.lane.b32.xlu0 %v995_v28, %s1420_s1 }
 0xeda   :  { %1333 = vrcp.f32 %v988_v41 }
 0xee7   :  { %v1334_v43 = vpop.eup %1333 }
 0xf4b   :  { %v998_v24 = vpop.permute.xlu0 %997 }
 0xf4c   :  { %v1000_v42 = vadd.f32 %v998_v24, %v994_v11 }
 0xf4e   :  { %1335 = vtanh.f32 %v1000_v42 }
 0xf5b   :  { %v1336_v44 = vpop.eup %1335 }
 0xf5c   :  { %v1002_v45 = vmul.f32 %v1336_v44, %v1334_v43 }
 0xf5e   :  { %v1003_v46 = vpack.c.bf16 %v1002_v45, %v1002_v45 }
 0xf60   :  { %v1020_v47 = vrot.slane %v1003_v46, 3 }
 0xf62   :  { %1021 = vrot.lane.b32.xlu1 %v1020_v47, %s1420_s1 }
 0xfd4   :  { %v1022_v48 = vpop.permute.xlu1 %1021 }
 0xfd5   :  { %1199 = vmatmul.mubr.msk.bf16.vlgmr.msra.gmra.mxu1 %vm274_vm2, %v1022_v48 }
0x1095   :  { %v1084_v50 = vpop.f32.mrf.mxu1 }
0x1096   :  { %v1085_v51 = vadd.f32 %v1179_v49, %v1084_v50 }
0x1097   :  { %v1200_v6 = vpop.f32.mrf.mxu1 }
0x1098   :  { %1090 = vst [vmem:[#allocation10] sm:$0x3] %v1085_v51 }
0x1099   :  { %v1087_v52 = vpop.f32.mrf.mxu1 }
0x109a   :  { %1396 = shalt.err (!%p1393_p0)
}
0x109b   :  { %1100 = dma.vmem_to_hbm [thread:$0]  %s1098_s28, 32, %s1806_s7, [#allocation5]   ;;  %v1201_v53 = vpop.f32.mrf.mxu1 }
0x109c   :  { %1411 = dma.done.wait [#allocation5], 32  }
0x109d   :  { %1412 = vsyncadd [#allocation5], 4294967264 }
0x109e   :  { %1104 = vsyncpa [#allocation4], 1 }
0x109f   :  { %1105 = vsyncpa [#allocation9], 1 }
0x10a0   :  { %1106 = vsyncpa [#allocation5], 1 }
0x10a1   :  { %1107 = vsyncpa [#allocation6], 1 }

</bundles_post_ra>
